<compile_context>
chip_gen: v7x
topology: tpu7x:2x2x1
jax: 0.10.0
libtpu: 0.0.40
codegen_flags: <defaults>
</compile_context>

<pallas_src>
import functools

import jax
import jax.numpy as jnp
from jax.experimental import pallas as pl
from jax.experimental.pallas import tpu as pltpu


def _round_up(x, m):
    return (x + m - 1) // m * m


# ----------------------------------------------------------------------------
# Fused bottleneck kernel (one replicate-padded image per grid step)
# ----------------------------------------------------------------------------
def _bottleneck_fused_kernel(
    x_ref,      # (m_img, cin_p)   bf16   padded image, flattened (Hp*Wp, C)
    w1_ref,     # (cin_p, cw_p)    bf16
    s1_ref, b1_ref,   # (1, cw_p)  f32
    w2_ref,     # (9, cw_p, cw_p)  bf16   tap-major 3x3 weights
    s2_ref, b2_ref,   # (1, cw_p)  f32
    w3_ref,     # (cw_p, cout_p)   bf16
    s3_ref, b3_ref,   # (1, cout_p) f32
    o_ref,      # (m_img, cout_p)  bf16
    h1_scr,     # VMEM (2*pad_rows + m_img, cw_p) f32
    *, m_img, w_p2, pad_rows):
    f32 = jnp.float32

    # ---- conv1 (1x1) + bn1 + relu over every replicate-padded pixel --------
    h1 = jnp.dot(x_ref[...], w1_ref[...], preferred_element_type=f32)
    h1 = jnp.maximum(h1 * s1_ref[...] + b1_ref[...], 0.0)

    # Stage h1 in VMEM with `pad_rows` rows of zero slack on both ends so the
    # 9 shifted tap reads below stay in bounds. Values read from the slack
    # only ever reach border rows, which the wrapper discards.
    h1_scr[...] = jnp.zeros(h1_scr.shape, h1_scr.dtype)
    h1_scr[pl.ds(pad_rows, m_img), :] = h1

    # ---- conv2 (3x3, replicate pad) + bn2 + relu: 9 shifted MXU matmuls ----
    cw = h1_scr.shape[1]
    acc = jnp.zeros((m_img, cw), f32)
    for t in range(9):
        ky, kx = t // 3, t % 3
        off = (ky - 1) * w_p2 + (kx - 1)          # static row shift
        tap = h1_scr[pl.ds(pad_rows + off, m_img), :].astype(jnp.bfloat16)
        acc = acc + jnp.dot(tap, w2_ref[t], preferred_element_type=f32)
    h2 = jnp.maximum(acc * s2_ref[...] + b2_ref[...], 0.0)

    # ---- conv3 (1x1) + bn3 + identity add + relu ---------------------------
    y = jnp.dot(h2.astype(jnp.bfloat16), w3_ref[...], preferred_element_type=f32)
    y = y * s3_ref[...] + b3_ref[...]
    y = y + x_ref[...].astype(f32)                # identity (inplanes == out_ch)
    o_ref[...] = jnp.maximum(y, 0.0).astype(o_ref.dtype)


# ----------------------------------------------------------------------------
# Parameter initialization (deterministic, synthetic)
# ----------------------------------------------------------------------------
def init_bottleneck_params(key, inplanes, planes, num_conds,
                           base_width=64, groups=1, expansion=4):
    width = int(planes * (base_width / 64.0)) * groups
    out_ch = planes * expansion
    keys = jax.random.split(key, 6)

    def bn_params(k, c):
        k1, k2, k3, k4 = jax.random.split(k, 4)
        return dict(
            gamma=1.0 + 0.1 * jax.random.normal(k1, (num_conds, c), jnp.float32),
            beta=0.1 * jax.random.normal(k2, (num_conds, c), jnp.float32),
            mean=0.1 * jax.random.normal(k3, (num_conds, c), jnp.float32),
            var=1.0 + 0.1 * jnp.abs(jax.random.normal(k4, (num_conds, c), jnp.float32)),
        )

    # conv weights stored matmul-ready:
    #   w1: (inplanes, width)          [PyTorch (width, inplanes, 1, 1)]
    #   w2: (9, width, width) tap-major, [cin, cout] per tap
    #   w3: (width, out_ch)            [PyTorch (out_ch, width, 1, 1)]
    return dict(
        w1=0.2 * jax.random.normal(keys[0], (inplanes, width), jnp.float32),
        w2=0.2 * jax.random.normal(keys[1], (9, width, width), jnp.float32),
        w3=0.2 * jax.random.normal(keys[2], (width, out_ch), jnp.float32),
        bn1=bn_params(keys[3], width),
        bn2=bn_params(keys[4], width),
        bn3=bn_params(keys[5], out_ch),
    )


def fold_bn(bn, cond, c_pad=None, eps=1e-5):
    """Eval-mode BN folded into per-channel scale/shift, selected by cond."""
    gamma = bn["gamma"][cond]
    beta = bn["beta"][cond]
    mean = bn["mean"][cond]
    var = bn["var"][cond]
    scale = gamma * jax.lax.rsqrt(var + eps)
    shift = beta - mean * scale
    if c_pad is not None:
        scale = jnp.pad(scale, (0, c_pad - scale.shape[0]))
        shift = jnp.pad(shift, (0, c_pad - shift.shape[0]))
    return scale[None, :].astype(jnp.float32), shift[None, :].astype(jnp.float32)


# ----------------------------------------------------------------------------
# Bottleneck forward (NHWC core + NCHW wrapper)
# ----------------------------------------------------------------------------
def bottleneck_forward_nhwc(params, x_nhwc, cond):
    N, H, W, Cin = x_nhwc.shape
    width = params["w1"].shape[1]
    out_ch = params["w3"].shape[1]
    assert Cin == out_ch, "no-downsample block requires inplanes == planes*4"

    Hp, Wp = H + 2, W + 2
    m_img = Hp * Wp
    cin_p = _round_up(Cin, 128)
    cw_p = _round_up(width, 128)
    cout_p = _round_up(out_ch, 128)
    pad_rows = _round_up(Wp + 2, 8)               # >= Wp + 1 slack rows

    # Replicate-pad spatially (commutes with pointwise conv1+bn1+relu so the
    # padded h1 equals replicate-pad(h1)); zero-pad channels to lane multiple.
    xp = jnp.pad(x_nhwc.astype(jnp.float32),
                 ((0, 0), (1, 1), (1, 1), (0, 0)), mode="edge")
    xp = jnp.pad(xp, ((0, 0), (0, 0), (0, 0), (0, cin_p - Cin)))
    xp = xp.reshape(N, m_img, cin_p).astype(jnp.bfloat16)

    # Zero-padded bf16 weights (padded rows/cols are zero -> exact real chans).
    w1 = jnp.pad(params["w1"],
                 ((0, cin_p - Cin), (0, cw_p - width))).astype(jnp.bfloat16)
    w2 = jnp.pad(params["w2"],
                 ((0, 0), (0, cw_p - width), (0, cw_p - width))).astype(jnp.bfloat16)
    w3 = jnp.pad(params["w3"],
                 ((0, cw_p - width), (0, cout_p - out_ch))).astype(jnp.bfloat16)

    s1, b1 = fold_bn(params["bn1"], cond, cw_p)
    s2, b2 = fold_bn(params["bn2"], cond, cw_p)
    s3, b3 = fold_bn(params["bn3"], cond, cout_p)

    kernel = functools.partial(_bottleneck_fused_kernel,
                               m_img=m_img, w_p2=Wp, pad_rows=pad_rows)

    flops = 2 * N * m_img * (cin_p * cw_p + 9 * cw_p * cw_p + cw_p * cout_p)
    bytes_accessed = (N * m_img * (cin_p + cout_p) * 2
                      + (cin_p * cw_p + 9 * cw_p * cw_p + cw_p * cout_p) * 2
                      + (4 * cw_p + 2 * cout_p) * 4)

    out = pl.pallas_call(
        kernel,
        out_shape=jax.ShapeDtypeStruct((N, m_img, cout_p), jnp.bfloat16),
        grid_spec=pltpu.PrefetchScalarGridSpec(
            num_scalar_prefetch=0,
            grid=(N,),
            in_specs=[
                pl.BlockSpec((None, m_img, cin_p), lambda n: (n, 0, 0)),   # x
                pl.BlockSpec((cin_p, cw_p), lambda n: (0, 0)),             # w1
                pl.BlockSpec((1, cw_p), lambda n: (0, 0)),                 # s1
                pl.BlockSpec((1, cw_p), lambda n: (0, 0)),                 # b1
                pl.BlockSpec((9, cw_p, cw_p), lambda n: (0, 0, 0)),        # w2
                pl.BlockSpec((1, cw_p), lambda n: (0, 0)),                 # s2
                pl.BlockSpec((1, cw_p), lambda n: (0, 0)),                 # b2
                pl.BlockSpec((cw_p, cout_p), lambda n: (0, 0)),            # w3
                pl.BlockSpec((1, cout_p), lambda n: (0, 0)),               # s3
                pl.BlockSpec((1, cout_p), lambda n: (0, 0)),               # b3
            ],
            out_specs=pl.BlockSpec((None, m_img, cout_p), lambda n: (n, 0, 0)),
            scratch_shapes=[
                pltpu.VMEM((2 * pad_rows + m_img, cw_p), jnp.float32)],
        ),
        compiler_params=pltpu.CompilerParams(
            dimension_semantics=("parallel",),
            vmem_limit_bytes=48 * 1024 * 1024),
        cost_estimate=pl.CostEstimate(
            flops=flops, transcendentals=0, bytes_accessed=bytes_accessed),
    )(xp, w1, s1, b1, w2, s2, b2, w3, s3, b3)

    # Drop the spatial halo and the zero-padded channels.
    out = out.reshape(N, Hp, Wp, cout_p)[:, 1:H + 1, 1:W + 1, :out_ch]
    return out.astype(jnp.float32)


def bottleneck_forward(params, x_nchw, cond):
    # NCHW (PyTorch) -> NHWC; for stacked blocks keep NHWC end-to-end instead.
    x = jnp.transpose(x_nchw, (0, 2, 3, 1))
    out = bottleneck_forward_nhwc(params, x, cond)
    return jnp.transpose(out, (0, 3, 1, 2))


# ----------------------------------------------------------------------------
# Pure-JAX reference (f32) for self-checking
# ----------------------------------------------------------------------------
def bottleneck_reference(params, x_nchw, cond):
    x = jnp.transpose(x_nchw, (0, 2, 3, 1)).astype(jnp.float32)
    N, H, W, _ = x.shape
    width = params["w1"].shape[1]
    s1, b1 = fold_bn(params["bn1"], cond)
    h1 = jnp.maximum(jnp.einsum("nhwc,cd->nhwd", x, params["w1"]) * s1 + b1, 0.0)
    h1p = jnp.pad(h1, ((0, 0), (1, 1), (1, 1), (0, 0)), mode="edge")
    acc = jnp.zeros((N, H, W, width), jnp.float32)
    for ky in range(3):
        for kx in range(3):
            acc = acc + jnp.einsum("nhwc,cd->nhwd",
                                   h1p[:, ky:ky + H, kx:kx + W, :],
                                   params["w2"][ky * 3 + kx])
    s2, b2 = fold_bn(params["bn2"], cond)
    h2 = jnp.maximum(acc * s2 + b2, 0.0)
    s3, b3 = fold_bn(params["bn3"], cond)
    y = jnp.einsum("nhwc,cd->nhwd", h2, params["w3"]) * s3 + b3 + x
    out = jnp.maximum(y, 0.0)
    return jnp.transpose(out, (0, 3, 1, 2))


# ----------------------------------------------------------------------------
if __name__ == "__main__":
    key = jax.random.PRNGKey(0)
    k_param, k_x = jax.random.split(key)

    # Small shapes consistent with the module:
    #   inplanes = planes * expansion (so the identity add needs no downsample)
    N, inplanes, planes, H, W = 2, 16, 4, 8, 8
    num_conds = 3
    cond = 1

    params = init_bottleneck_params(k_param, inplanes, planes, num_conds)
    x = jax.random.normal(k_x, (N, inplanes, H, W), jnp.float32)

    fwd = jax.jit(bottleneck_forward, static_argnums=2)
    out = jax.block_until_ready(fwd(params, x, cond))

    assert out.shape == (N, planes * 4, H, W), out.shape
    assert bool(jnp.all(jnp.isfinite(out)))
    assert bool(jnp.all(out >= 0.0))  # final ReLU

    # Self-check vs. pure-JAX f32 reference (loose tol: bf16 MXU feeds + bf16 I/O).
    ref = bottleneck_reference(params, x, cond)
    err = float(jnp.max(jnp.abs(out - ref)))
    assert err < 0.1, f"kernel vs reference mismatch: {err}"

    print("KERNEL_OK")
</pallas_src>

<mosaic_0001>
module attributes {stable_mosaic.version = 11 : i64} {
  func.func @_bottleneck_fused_kernel(%arg0: i32, %arg1: memref<1x100x128xbf16, #tpu.memory_space<vmem>>, %arg2: memref<128x128xbf16, #tpu.memory_space<vmem>>, %arg3: memref<1x128xf32, #tpu.memory_space<vmem>>, %arg4: memref<1x128xf32, #tpu.memory_space<vmem>>, %arg5: memref<9x128x128xbf16, #tpu.memory_space<vmem>>, %arg6: memref<1x128xf32, #tpu.memory_space<vmem>>, %arg7: memref<1x128xf32, #tpu.memory_space<vmem>>, %arg8: memref<128x128xbf16, #tpu.memory_space<vmem>>, %arg9: memref<1x128xf32, #tpu.memory_space<vmem>>, %arg10: memref<1x128xf32, #tpu.memory_space<vmem>>, %arg11: memref<1x100x128xbf16, #tpu.memory_space<vmem>>, %arg12: memref<132x128xf32, #tpu.memory_space<vmem>>) attributes {dimension_semantics = [#tpu.dimension_semantics<parallel>], iteration_bounds = array<i64: 2>, scalar_prefetch = 0 : i64, scratch_operands = 1 : i64, tpu.core_type = #tpu.core_type<tc>, window_params = [{transform_indices = @transform_0, window_bounds = array<i64: 1, 100, 128>}, {pipeline_mode = #tpu.pipeline_mode<synchronous>, transform_indices = @transform_1, window_bounds = array<i64: 128, 128>}, {pipeline_mode = #tpu.pipeline_mode<synchronous>, transform_indices = @transform_2, window_bounds = array<i64: 1, 128>}, {pipeline_mode = #tpu.pipeline_mode<synchronous>, transform_indices = @transform_3, window_bounds = array<i64: 1, 128>}, {pipeline_mode = #tpu.pipeline_mode<synchronous>, transform_indices = @transform_4, window_bounds = array<i64: 9, 128, 128>}, {pipeline_mode = #tpu.pipeline_mode<synchronous>, transform_indices = @transform_5, window_bounds = array<i64: 1, 128>}, {pipeline_mode = #tpu.pipeline_mode<synchronous>, transform_indices = @transform_6, window_bounds = array<i64: 1, 128>}, {pipeline_mode = #tpu.pipeline_mode<synchronous>, transform_indices = @transform_7, window_bounds = array<i64: 128, 128>}, {pipeline_mode = #tpu.pipeline_mode<synchronous>, transform_indices = @transform_8, window_bounds = array<i64: 1, 128>}, {pipeline_mode = #tpu.pipeline_mode<synchronous>, transform_indices = @transform_9, window_bounds = array<i64: 1, 128>}, {transform_indices = @transform_10, window_bounds = array<i64: 1, 100, 128>}]} {
    %c0 = arith.constant 0 : index
    %c0_0 = arith.constant 0 : index
    %c0_1 = arith.constant 0 : index
    %0 = vector.load %arg1[%c0, %c0_0, %c0_1] : memref<1x100x128xbf16, #tpu.memory_space<vmem>>, vector<1x100x128xbf16>
    %1 = vector.shape_cast %0 : vector<1x100x128xbf16> to vector<100x128xbf16>
    %c0_2 = arith.constant 0 : index
    %c0_3 = arith.constant 0 : index
    %2 = vector.load %arg2[%c0_2, %c0_3] : memref<128x128xbf16, #tpu.memory_space<vmem>>, vector<128x128xbf16>
    %cst = arith.constant dense<0.000000e+00> : vector<100x128xf32>
    %3 = tpu.matmul %1, %2, %cst {dimension_numbers = #tpu.dot_dimension_numbers<[1], [0], [0], [1], [0, 0, 1, 1], [], []>} : vector<100x128xbf16>, vector<128x128xbf16>, vector<100x128xf32> -> vector<100x128xf32>
    %c0_4 = arith.constant 0 : index
    %c0_5 = arith.constant 0 : index
    %4 = vector.load %arg3[%c0_4, %c0_5] : memref<1x128xf32, #tpu.memory_space<vmem>>, vector<1x128xf32>
    %5 = vector.broadcast %4 : vector<1x128xf32> to vector<100x128xf32>
    %6 = arith.mulf %3, %5 : vector<100x128xf32>
    %c0_6 = arith.constant 0 : index
    %c0_7 = arith.constant 0 : index
    %7 = vector.load %arg4[%c0_6, %c0_7] : memref<1x128xf32, #tpu.memory_space<vmem>>, vector<1x128xf32>
    %8 = vector.broadcast %7 : vector<1x128xf32> to vector<100x128xf32>
    %9 = arith.addf %6, %8 : vector<100x128xf32>
    %cst_8 = arith.constant 0.000000e+00 : f32
    %10 = vector.broadcast %cst_8 : f32 to vector<100x128xf32>
    %11 = arith.maximumf %9, %10 : vector<100x128xf32>
    %cst_9 = arith.constant 0.000000e+00 : f32
    %12 = vector.broadcast %cst_9 : f32 to vector<132x128xf32>
    %c0_10 = arith.constant 0 : index
    %c0_11 = arith.constant 0 : index
    %13 = vector.load %arg12[%c0_10, %c0_11] : memref<132x128xf32, #tpu.memory_space<vmem>>, vector<132x128xf32>
    tpu.vector_store %arg12[%c0_10, %c0_11], %12 {strides = array<i32>} : memref<132x128xf32, #tpu.memory_space<vmem>>, vector<132x128xf32>,
    %c16 = arith.constant 16 : index
    %c0_12 = arith.constant 0 : index
    %14 = vector.load %arg12[%c16, %c0_12] : memref<132x128xf32, #tpu.memory_space<vmem>>, vector<100x128xf32>
    tpu.vector_store %arg12[%c16, %c0_12], %11 {strides = array<i32>} : memref<132x128xf32, #tpu.memory_space<vmem>>, vector<100x128xf32>,
    %cst_13 = arith.constant 0.000000e+00 : f32
    %15 = vector.broadcast %cst_13 : f32 to vector<100x128xf32>
    %c5 = arith.constant 5 : index
    %c0_14 = arith.constant 0 : index
    %16 = vector.load %arg12[%c5, %c0_14] : memref<132x128xf32, #tpu.memory_space<vmem>>, vector<100x128xf32>
    %17 = arith.truncf %16 : vector<100x128xf32> to vector<100x128xbf16>
    %c0_15 = arith.constant 0 : index
    %c0_16 = arith.constant 0 : index
    %c0_17 = arith.constant 0 : index
    %18 = vector.load %arg5[%c0_15, %c0_16, %c0_17] : memref<9x128x128xbf16, #tpu.memory_space<vmem>>, vector<1x128x128xbf16>
    %19 = vector.shape_cast %18 : vector<1x128x128xbf16> to vector<128x128xbf16>
    %cst_18 = arith.constant dense<0.000000e+00> : vector<100x128xf32>
    %20 = tpu.matmul %17, %19, %cst_18 {dimension_numbers = #tpu.dot_dimension_numbers<[1], [0], [0], [1], [0, 0, 1, 1], [], []>} : vector<100x128xbf16>, vector<128x128xbf16>, vector<100x128xf32> -> vector<100x128xf32>
    %21 = arith.addf %15, %20 : vector<100x128xf32>
    %c6 = arith.constant 6 : index
    %c0_19 = arith.constant 0 : index
    %22 = vector.load %arg12[%c6, %c0_19] : memref<132x128xf32, #tpu.memory_space<vmem>>, vector<100x128xf32>
    %23 = arith.truncf %22 : vector<100x128xf32> to vector<100x128xbf16>
    %c1 = arith.constant 1 : index
    %c0_20 = arith.constant 0 : index
    %c0_21 = arith.constant 0 : index
    %24 = vector.load %arg5[%c1, %c0_20, %c0_21] : memref<9x128x128xbf16, #tpu.memory_space<vmem>>, vector<1x128x128xbf16>
    %25 = vector.shape_cast %24 : vector<1x128x128xbf16> to vector<128x128xbf16>
    %cst_22 = arith.constant dense<0.000000e+00> : vector<100x128xf32>
    %26 = tpu.matmul %23, %25, %cst_22 {dimension_numbers = #tpu.dot_dimension_numbers<[1], [0], [0], [1], [0, 0, 1, 1], [], []>} : vector<100x128xbf16>, vector<128x128xbf16>, vector<100x128xf32> -> vector<100x128xf32>
    %27 = arith.addf %21, %26 : vector<100x128xf32>
    %c7 = arith.constant 7 : index
    %c0_23 = arith.constant 0 : index
    %28 = vector.load %arg12[%c7, %c0_23] : memref<132x128xf32, #tpu.memory_space<vmem>>, vector<100x128xf32>
    %29 = arith.truncf %28 : vector<100x128xf32> to vector<100x128xbf16>
    %c2 = arith.constant 2 : index
    %c0_24 = arith.constant 0 : index
    %c0_25 = arith.constant 0 : index
    %30 = vector.load %arg5[%c2, %c0_24, %c0_25] : memref<9x128x128xbf16, #tpu.memory_space<vmem>>, vector<1x128x128xbf16>
    %31 = vector.shape_cast %30 : vector<1x128x128xbf16> to vector<128x128xbf16>
    %cst_26 = arith.constant dense<0.000000e+00> : vector<100x128xf32>
    %32 = tpu.matmul %29, %31, %cst_26 {dimension_numbers = #tpu.dot_dimension_numbers<[1], [0], [0], [1], [0, 0, 1, 1], [], []>} : vector<100x128xbf16>, vector<128x128xbf16>, vector<100x128xf32> -> vector<100x128xf32>
    %33 = arith.addf %27, %32 : vector<100x128xf32>
    %c15 = arith.constant 15 : index
    %c0_27 = arith.constant 0 : index
    %34 = vector.load %arg12[%c15, %c0_27] : memref<132x128xf32, #tpu.memory_space<vmem>>, vector<100x128xf32>
    %35 = arith.truncf %34 : vector<100x128xf32> to vector<100x128xbf16>
    %c3 = arith.constant 3 : index
    %c0_28 = arith.constant 0 : index
    %c0_29 = arith.constant 0 : index
    %36 = vector.load %arg5[%c3, %c0_28, %c0_29] : memref<9x128x128xbf16, #tpu.memory_space<vmem>>, vector<1x128x128xbf16>
    %37 = vector.shape_cast %36 : vector<1x128x128xbf16> to vector<128x128xbf16>
    %cst_30 = arith.constant dense<0.000000e+00> : vector<100x128xf32>
    %38 = tpu.matmul %35, %37, %cst_30 {dimension_numbers = #tpu.dot_dimension_numbers<[1], [0], [0], [1], [0, 0, 1, 1], [], []>} : vector<100x128xbf16>, vector<128x128xbf16>, vector<100x128xf32> -> vector<100x128xf32>
    %39 = arith.addf %33, %38 : vector<100x128xf32>
    %c16_31 = arith.constant 16 : index
    %c0_32 = arith.constant 0 : index
    %40 = vector.load %arg12[%c16_31, %c0_32] : memref<132x128xf32, #tpu.memory_space<vmem>>, vector<100x128xf32>
    %41 = arith.truncf %40 : vector<100x128xf32> to vector<100x128xbf16>
    %c4 = arith.constant 4 : index
    %c0_33 = arith.constant 0 : index
    %c0_34 = arith.constant 0 : index
    %42 = vector.load %arg5[%c4, %c0_33, %c0_34] : memref<9x128x128xbf16, #tpu.memory_space<vmem>>, vector<1x128x128xbf16>
    %43 = vector.shape_cast %42 : vector<1x128x128xbf16> to vector<128x128xbf16>
    %cst_35 = arith.constant dense<0.000000e+00> : vector<100x128xf32>
    %44 = tpu.matmul %41, %43, %cst_35 {dimension_numbers = #tpu.dot_dimension_numbers<[1], [0], [0], [1], [0, 0, 1, 1], [], []>} : vector<100x128xbf16>, vector<128x128xbf16>, vector<100x128xf32> -> vector<100x128xf32>
    %45 = arith.addf %39, %44 : vector<100x128xf32>
    %c17 = arith.constant 17 : index
    %c0_36 = arith.constant 0 : index
    %46 = vector.load %arg12[%c17, %c0_36] : memref<132x128xf32, #tpu.memory_space<vmem>>, vector<100x128xf32>
    %47 = arith.truncf %46 : vector<100x128xf32> to vector<100x128xbf16>
    %c5_37 = arith.constant 5 : index
    %c0_38 = arith.constant 0 : index
    %c0_39 = arith.constant 0 : index
    %48 = vector.load %arg5[%c5_37, %c0_38, %c0_39] : memref<9x128x128xbf16, #tpu.memory_space<vmem>>, vector<1x128x128xbf16>
    %49 = vector.shape_cast %48 : vector<1x128x128xbf16> to vector<128x128xbf16>
    %cst_40 = arith.constant dense<0.000000e+00> : vector<100x128xf32>
    %50 = tpu.matmul %47, %49, %cst_40 {dimension_numbers = #tpu.dot_dimension_numbers<[1], [0], [0], [1], [0, 0, 1, 1], [], []>} : vector<100x128xbf16>, vector<128x128xbf16>, vector<100x128xf32> -> vector<100x128xf32>
    %51 = arith.addf %45, %50 : vector<100x128xf32>
    %c25 = arith.constant 25 : index
    %c0_41 = arith.constant 0 : index
    %52 = vector.load %arg12[%c25, %c0_41] : memref<132x128xf32, #tpu.memory_space<vmem>>, vector<100x128xf32>
    %53 = arith.truncf %52 : vector<100x128xf32> to vector<100x128xbf16>
    %c6_42 = arith.constant 6 : index
    %c0_43 = arith.constant 0 : index
    %c0_44 = arith.constant 0 : index
    %54 = vector.load %arg5[%c6_42, %c0_43, %c0_44] : memref<9x128x128xbf16, #tpu.memory_space<vmem>>, vector<1x128x128xbf16>
    %55 = vector.shape_cast %54 : vector<1x128x128xbf16> to vector<128x128xbf16>
    %cst_45 = arith.constant dense<0.000000e+00> : vector<100x128xf32>
    %56 = tpu.matmul %53, %55, %cst_45 {dimension_numbers = #tpu.dot_dimension_numbers<[1], [0], [0], [1], [0, 0, 1, 1], [], []>} : vector<100x128xbf16>, vector<128x128xbf16>, vector<100x128xf32> -> vector<100x128xf32>
    %57 = arith.addf %51, %56 : vector<100x128xf32>
    %c26 = arith.constant 26 : index
    %c0_46 = arith.constant 0 : index
    %58 = vector.load %arg12[%c26, %c0_46] : memref<132x128xf32, #tpu.memory_space<vmem>>, vector<100x128xf32>
    %59 = arith.truncf %58 : vector<100x128xf32> to vector<100x128xbf16>
    %c7_47 = arith.constant 7 : index
    %c0_48 = arith.constant 0 : index
    %c0_49 = arith.constant 0 : index
    %60 = vector.load %arg5[%c7_47, %c0_48, %c0_49] : memref<9x128x128xbf16, #tpu.memory_space<vmem>>, vector<1x128x128xbf16>
    %61 = vector.shape_cast %60 : vector<1x128x128xbf16> to vector<128x128xbf16>
    %cst_50 = arith.constant dense<0.000000e+00> : vector<100x128xf32>
    %62 = tpu.matmul %59, %61, %cst_50 {dimension_numbers = #tpu.dot_dimension_numbers<[1], [0], [0], [1], [0, 0, 1, 1], [], []>} : vector<100x128xbf16>, vector<128x128xbf16>, vector<100x128xf32> -> vector<100x128xf32>
    %63 = arith.addf %57, %62 : vector<100x128xf32>
    %c27 = arith.constant 27 : index
    %c0_51 = arith.constant 0 : index
    %64 = vector.load %arg12[%c27, %c0_51] : memref<132x128xf32, #tpu.memory_space<vmem>>, vector<100x128xf32>
    %65 = arith.truncf %64 : vector<100x128xf32> to vector<100x128xbf16>
    %c8 = arith.constant 8 : index
    %c0_52 = arith.constant 0 : index
    %c0_53 = arith.constant 0 : index
    %66 = vector.load %arg5[%c8, %c0_52, %c0_53] : memref<9x128x128xbf16, #tpu.memory_space<vmem>>, vector<1x128x128xbf16>
    %67 = vector.shape_cast %66 : vector<1x128x128xbf16> to vector<128x128xbf16>
    %cst_54 = arith.constant dense<0.000000e+00> : vector<100x128xf32>
    %68 = tpu.matmul %65, %67, %cst_54 {dimension_numbers = #tpu.dot_dimension_numbers<[1], [0], [0], [1], [0, 0, 1, 1], [], []>} : vector<100x128xbf16>, vector<128x128xbf16>, vector<100x128xf32> -> vector<100x128xf32>
    %69 = arith.addf %63, %68 : vector<100x128xf32>
    %c0_55 = arith.constant 0 : index
    %c0_56 = arith.constant 0 : index
    %70 = vector.load %arg6[%c0_55, %c0_56] : memref<1x128xf32, #tpu.memory_space<vmem>>, vector<1x128xf32>
    %71 = vector.broadcast %70 : vector<1x128xf32> to vector<100x128xf32>
    %72 = arith.mulf %69, %71 : vector<100x128xf32>
    %c0_57 = arith.constant 0 : index
    %c0_58 = arith.constant 0 : index
    %73 = vector.load %arg7[%c0_57, %c0_58] : memref<1x128xf32, #tpu.memory_space<vmem>>, vector<1x128xf32>
    %74 = vector.broadcast %73 : vector<1x128xf32> to vector<100x128xf32>
    %75 = arith.addf %72, %74 : vector<100x128xf32>
    %cst_59 = arith.constant 0.000000e+00 : f32
    %76 = vector.broadcast %cst_59 : f32 to vector<100x128xf32>
    %77 = arith.maximumf %75, %76 : vector<100x128xf32>
    %78 = arith.truncf %77 : vector<100x128xf32> to vector<100x128xbf16>
    %c0_60 = arith.constant 0 : index
    %c0_61 = arith.constant 0 : index
    %79 = vector.load %arg8[%c0_60, %c0_61] : memref<128x128xbf16, #tpu.memory_space<vmem>>, vector<128x128xbf16>
    %cst_62 = arith.constant dense<0.000000e+00> : vector<100x128xf32>
    %80 = tpu.matmul %78, %79, %cst_62 {dimension_numbers = #tpu.dot_dimension_numbers<[1], [0], [0], [1], [0, 0, 1, 1], [], []>} : vector<100x128xbf16>, vector<128x128xbf16>, vector<100x128xf32> -> vector<100x128xf32>
    %c0_63 = arith.constant 0 : index
    %c0_64 = arith.constant 0 : index
    %81 = vector.load %arg9[%c0_63, %c0_64] : memref<1x128xf32, #tpu.memory_space<vmem>>, vector<1x128xf32>
    %82 = vector.broadcast %81 : vector<1x128xf32> to vector<100x128xf32>
    %83 = arith.mulf %80, %82 : vector<100x128xf32>
    %c0_65 = arith.constant 0 : index
    %c0_66 = arith.constant 0 : index
    %84 = vector.load %arg10[%c0_65, %c0_66] : memref<1x128xf32, #tpu.memory_space<vmem>>, vector<1x128xf32>
    %85 = vector.broadcast %84 : vector<1x128xf32> to vector<100x128xf32>
    %86 = arith.addf %83, %85 : vector<100x128xf32>
    %c0_67 = arith.constant 0 : index
    %c0_68 = arith.constant 0 : index
    %c0_69 = arith.constant 0 : index
    %87 = vector.load %arg1[%c0_67, %c0_68, %c0_69] : memref<1x100x128xbf16, #tpu.memory_space<vmem>>, vector<1x100x128xbf16>
    %88 = vector.shape_cast %87 : vector<1x100x128xbf16> to vector<100x128xbf16>
    %89 = arith.extf %88 : vector<100x128xbf16> to vector<100x128xf32>
    %90 = arith.addf %86, %89 : vector<100x128xf32>
    %cst_70 = arith.constant 0.000000e+00 : f32
    %91 = vector.broadcast %cst_70 : f32 to vector<100x128xf32>
    %92 = arith.maximumf %90, %91 : vector<100x128xf32>
    %93 = arith.truncf %92 : vector<100x128xf32> to vector<100x128xbf16>
    %c0_71 = arith.constant 0 : index
    %c0_72 = arith.constant 0 : index
    %c0_73 = arith.constant 0 : index
    %94 = vector.load %arg11[%c0_71, %c0_72, %c0_73] : memref<1x100x128xbf16, #tpu.memory_space<vmem>>, vector<1x100x128xbf16>
    %95 = vector.shape_cast %94 : vector<1x100x128xbf16> to vector<100x128xbf16>
    %96 = vector.shape_cast %93 : vector<100x128xbf16> to vector<1x100x128xbf16>
    tpu.vector_store %arg11[%c0_71, %c0_72, %c0_73], %96 {strides = array<i32>} : memref<1x100x128xbf16, #tpu.memory_space<vmem>>, vector<1x100x128xbf16>,
    return
  }
  func.func @transform_0(%arg0: i32) -> (i32, i32, i32) {
    %c0_i32 = arith.constant 0 : i32
    %c0_i32_0 = arith.constant 0 : i32
    %c0_i32_1 = arith.constant 0 : i32
    return %arg0, %c0_i32, %c0_i32_0 : i32, i32, i32
  }
  func.func @transform_1(%arg0: i32) -> (i32, i32) {
    %c0_i32 = arith.constant 0 : i32
    %c0_i32_0 = arith.constant 0 : i32
    %c0_i32_1 = arith.constant 0 : i32
    return %c0_i32, %c0_i32_0 : i32, i32
  }
  func.func @transform_2(%arg0: i32) -> (i32, i32) {
    %c0_i32 = arith.constant 0 : i32
    %c0_i32_0 = arith.constant 0 : i32
    %c0_i32_1 = arith.constant 0 : i32
    return %c0_i32, %c0_i32_0 : i32, i32
  }
  func.func @transform_3(%arg0: i32) -> (i32, i32) {
    %c0_i32 = arith.constant 0 : i32
    %c0_i32_0 = arith.constant 0 : i32
    %c0_i32_1 = arith.constant 0 : i32
    return %c0_i32, %c0_i32_0 : i32, i32
  }
  func.func @transform_4(%arg0: i32) -> (i32, i32, i32) {
    %c0_i32 = arith.constant 0 : i32
    %c0_i32_0 = arith.constant 0 : i32
    %c0_i32_1 = arith.constant 0 : i32
    %c0_i32_2 = arith.constant 0 : i32
    return %c0_i32, %c0_i32_0, %c0_i32_1 : i32, i32, i32
  }
  func.func @transform_5(%arg0: i32) -> (i32, i32) {
    %c0_i32 = arith.constant 0 : i32
    %c0_i32_0 = arith.constant 0 : i32
    %c0_i32_1 = arith.constant 0 : i32
    return %c0_i32, %c0_i32_0 : i32, i32
  }
  func.func @transform_6(%arg0: i32) -> (i32, i32) {
    %c0_i32 = arith.constant 0 : i32
    %c0_i32_0 = arith.constant 0 : i32
    %c0_i32_1 = arith.constant 0 : i32
    return %c0_i32, %c0_i32_0 : i32, i32
  }
  func.func @transform_7(%arg0: i32) -> (i32, i32) {
    %c0_i32 = arith.constant 0 : i32
    %c0_i32_0 = arith.constant 0 : i32
    %c0_i32_1 = arith.constant 0 : i32
    return %c0_i32, %c0_i32_0 : i32, i32
  }
  func.func @transform_8(%arg0: i32) -> (i32, i32) {
    %c0_i32 = arith.constant 0 : i32
    %c0_i32_0 = arith.constant 0 : i32
    %c0_i32_1 = arith.constant 0 : i32
    return %c0_i32, %c0_i32_0 : i32, i32
  }
  func.func @transform_9(%arg0: i32) -> (i32, i32) {
    %c0_i32 = arith.constant 0 : i32
    %c0_i32_0 = arith.constant 0 : i32
    %c0_i32_1 = arith.constant 0 : i32
    return %c0_i32, %c0_i32_0 : i32, i32
  }
  func.func @transform_10(%arg0: i32) -> (i32, i32, i32) {
    %c0_i32 = arith.constant 0 : i32
    %c0_i32_0 = arith.constant 0 : i32
    %c0_i32_1 = arith.constant 0 : i32
    return %arg0, %c0_i32, %c0_i32_0 : i32, i32, i32
  }
}

</mosaic_0001>

<bundles_post_ra>
// kernel: bottleneck_forward.1
= control target key start
LH: loop header
LB: loop body
LE: loop exit
PB: predicated region body
PF: predicated region fallthrough
CT: control target
= control target key end

     0   :  { %s4095_s13 = smov 0   ;;  %s4929_s0 = inlined_call_operand.vmem [shape: bf16[2,100,128], index: 0, kind: input, shape index: {}]   ;;  %s4930_s1 = inlined_call_operand.vmem [shape: bf16[128,128], index: 1, kind: input, shape index: {}]   ;;  %s4931_s2 = inlined_call_operand.vmem [shape: f32[1,128], index: 2, kind: input, shape index: {}]   ;;  %s4932_s3 = inlined_call_operand.vmem [shape: f32[1,128], index: 3, kind: input, shape index: {}]   ;;  %s4933_s4 = inlined_call_operand.vmem [shape: bf16[9,128,128], index: 4, kind: input, shape index: {}]   ;;  %s4934_s5 = inlined_call_operand.vmem [shape: f32[1,128], index: 5, kind: input, shape index: {}]   ;;  %s4935_s6 = inlined_call_operand.vmem [shape: f32[1,128], index: 6, kind: input, shape index: {}]   ;;  %s4936_s7 = inlined_call_operand.vmem [shape: bf16[128,128], index: 7, kind: input, shape index: {}]   ;;  %s4937_s8 = inlined_call_operand.vmem [shape: f32[1,128], index: 8, kind: input, shape index: {}]   ;;  %s4938_s9 = inlined_call_operand.vmem [shape: f32[1,128], index: 9, kind: input, shape index: {}]   ;;  %s4939_s10 = inlined_call_operand.vmem [shape: bf16[2,100,128], index: 10, kind: output, shape index: {}]  }
   0x1 LB: > { %s2721_s14 = sadd.s32 4294967295, %s4036_s13   ;;  %p2725_p0 = scmp.ge.s32.totalorder %s4036_s13, 1  ;;  %s4036_s13 = sphi %s4095_s13, %s20_s13  }
   0x2   : > { %p312_p1 = scmp.lt.s32.totalorder %s4036_s13, 3 }
   0x4   : > { %p313_p2 = pnand %p2725_p0, %p312_p1 }
   0x5   : > { %v3934_v0 = vld [vmem:[%s4930_s1] sm:$0xff] (!%p313_p2)   ;;  %v4038_v1 = vmov (!%p313_p2), 0.0   ;;  %v3935_v2 = vld [vmem:[%s4930_s1 + $0x8] sm:$0xff] (!%p313_p2)   ;;  %vm4039_vm0 = vmmov (!%p313_p2), 0   ;;  %p350_p3 = scmp.lt.s32.totalorder (!%p313_p2), %s2721_s14, 1  ;;  %v3936_v3 = vld [vmem:[%s4930_s1 + $0x10] sm:$0xff] (!%p313_p2)  }
   0x6   : > { %316 = sbr.rel (%p313_p2) target bundleno = 1043 (0x413), region = 60  ;;  %3214 = vmatprep.subr.bf16.mxu0 (!%p313_p2), %v4038_v1  ;;  %619 = vst [vmem:[#allocation2] sm:$0xff] (!%p313_p2), %v4038_v1  ;;  %620 = vst [vmem:[#allocation2 + $0x8] sm:$0xff] (!%p313_p2), %v4038_v1  ;;  %3698 = vmatprep.subr.bf16.mxu1 (!%p313_p2), %v4038_v1  ;;  %v3937_v4 = vld [vmem:[%s4930_s1 + $0x18] sm:$0xff] (!%p313_p2)   ;;  %v3938_v5 = vld [vmem:[%s4930_s1 + $0x20] sm:$0xff] (!%p313_p2)  }
   0x7   : > { %633 = vst [vmem:[#allocation2 + $0x70] sm:$0xff] (!%p313_p2), %v4038_v1  ;;  %634 = vst [vmem:[#allocation2 + $0x78] sm:$0xff] (!%p313_p2), %v4038_v1  ;;  %3215 = vmatpush3.bf16.msra.mxu0 (!%p313_p2), %v3934_v0  ;;  %3230 = vmatprep.mubr.msk.bf16.mxu0 (!%p313_p2), %vm4039_vm0, %v4038_v1  ;;  %v3939_v6 = vld [vmem:[%s4930_s1 + $0x28] sm:$0xff] (!%p313_p2)   ;;  %v3940_v7 = vld [vmem:[%s4930_s1 + $0x30] sm:$0xff] (!%p313_p2)  }
   0x8   : > { %3216 = vmatprep.subr.bf16.mxu0 (!%p313_p2), %v4038_v1  ;;  %3418 = vmatprep.mubr.msk.bf16.mxu1 (!%p313_p2), %vm4039_vm0, %v4038_v1  ;;  %v3941_v8 = vld [vmem:[%s4930_s1 + $0x38] sm:$0xff] (!%p313_p2)   ;;  %v3949_v10 = vld [vmem:[%s4933_s4 + $0x40] sm:$0xff] (!%p313_p2)   ;;  %v3950_v11 = vld [vmem:[%s4933_s4 + $0x48] sm:$0xff] (!%p313_p2)  }
   0x9   : > { %v3951_v13 = vld [vmem:[%s4933_s4 + $0x50] sm:$0xff] (!%p313_p2)   ;;  %v3952_v14 = vld [vmem:[%s4933_s4 + $0x58] sm:$0xff] (!%p313_p2)   ;;  %v3953_v20 = vld [vmem:[%s4933_s4 + $0x60] sm:$0xff] (!%p313_p2)  }
   0xa   : > { %v3954_v21 = vld [vmem:[%s4933_s4 + $0x68] sm:$0xff] (!%p313_p2)   ;;  %v3955_v22 = vld [vmem:[%s4933_s4 + $0x70] sm:$0xff] (!%p313_p2)   ;;  %v4206_v23 = vld [vmem:[%s4933_s4 + $0xc0] sm:$0xff] (!%p313_p2)  }
   0xb   : > { %3217 = vmatpush3.bf16.msra.mxu0 (!%p313_p2), %v3935_v2  ;;  %3706 = vmatpush3.bf16.msra.mxu1 (!%p313_p2), %v4206_v23  ;;  %v3957_v24 = vld [vmem:[%s4933_s4 + $0x78] sm:$0xff] (!%p313_p2)   ;;  %v4217_v25 = vld [vmem:[%s4933_s4 + $0xc8] sm:$0xff] (!%p313_p2)   ;;  %v4225_v26 = vld [vmem:[%s4933_s4 + $0xd0] sm:$0xff] (!%p313_p2)  }
   0xc   : > { %3218 = vmatprep.subr.bf16.mxu0 (!%p313_p2), %v4038_v1  ;;  %3699 = vmatprep.subr.bf16.mxu1 (!%p313_p2), %v4038_v1  ;;  %v4232_v27 = vld [vmem:[%s4933_s4 + $0xd8] sm:$0xff] (!%p313_p2)   ;;  %v4239_v28 = vld [vmem:[%s4933_s4 + $0xe0] sm:$0xff] (!%p313_p2)   ;;  %v4246_v29 = vld [vmem:[%s4933_s4 + $0xe8] sm:$0xff] (!%p313_p2)  }
   0xd   : > { %s4941_s14 = smov (!%p350_p3, %s2721_s14), 1  ;;  %v4253_v30 = vld [vmem:[%s4933_s4 + $0xf0] sm:$0xff]   ;;  %v4260_v31 = vld [vmem:[%s4933_s4 + $0xf8] sm:$0xff]   ;;  %v4267_v32 = vld [vmem:[%s4931_s2] ss:$0 sm:$0xff] }
   0xe   : > { %s3923_s21 = smul.u32 52, %s4941_s14  ;;  %v4272_v34 = vld [vmem:[%s4932_s3] ss:$0 sm:$0xff]  ;;  %v685_v52 = vld [vmem:[#allocation2 + $0x6] sm:$0xff] }
   0xf   : > { %3219 = vmatpush3.bf16.msra.mxu0 %v3936_v3  ;;  %3707 = vmatpush3.bf16.msra.mxu1 %v4217_v25  ;;  %v3965_v56 = vld [vmem:[%s4933_s4] sm:$0xff]   ;;  %v3967_v0 = vld [vmem:[%s4933_s4 + $0x8] sm:$0xff]  }
  0x10   : > { %s4132_s24 = scalar_lea.vmem %s4929_s0, %s3923_s21  ;;  %3220 = vmatprep.subr.bf16.mxu0 %v4038_v1  ;;  %3700 = vmatprep.subr.bf16.mxu1 %v4038_v1  ;;  %s4891_s15 = scalar_lea.vmem %s4939_s10, %s3923_s21 }
  0x11   : > { %v3942_v9 = vld [vmem:[%s4132_s24] sm:$0xff]   ;;  %v3943_v12 = vld [vmem:[%s4132_s24 + $0x8] sm:$0xff]   ;;  %v3944_v15 = vld [vmem:[%s4132_s24 + $0x10] sm:$0xff]  }
  0x12   : > { %v3945_v16 = vld [vmem:[%s4132_s24 + $0x18] sm:$0xff]   ;;  %v3946_v17 = vld [vmem:[%s4132_s24 + $0x20] sm:$0xff]   ;;  %v3947_v18 = vld [vmem:[%s4132_s24 + $0x28] sm:$0xff]  }
  0x13   : > { %3221 = vmatpush3.bf16.msra.mxu0 %v3937_v4  ;;  %v3948_v19 = vld [vmem:[%s4132_s24 + $0x30] ss:$0 sps:$4 sm:$0x33]   ;;  %3708 = vmatpush3.bf16.msra.mxu1 %v4225_v26 }
  0x14   : > { %3222 = vmatprep.subr.bf16.mxu0 %v4038_v1  ;;  %3701 = vmatprep.subr.bf16.mxu1 %v4038_v1 }
  0x17   : > { %3223 = vmatpush3.bf16.msra.mxu0 %v3938_v5  ;;  %3709 = vmatpush3.bf16.msra.mxu1 %v4232_v27 }
  0x18   : > { %3224 = vmatprep.subr.bf16.mxu0 %v4038_v1  ;;  %3702 = vmatprep.subr.bf16.mxu1 %v4038_v1 }
  0x1b   : > { %3225 = vmatpush3.bf16.msra.mxu0 %v3939_v6  ;;  %3710 = vmatpush3.bf16.msra.mxu1 %v4239_v28 }
  0x1c   : > { %3226 = vmatprep.subr.bf16.mxu0 %v4038_v1  ;;  %3703 = vmatprep.subr.bf16.mxu1 %v4038_v1 }
  0x1f   : > { %3227 = vmatpush3.bf16.msra.mxu0 %v3940_v7  ;;  %3711 = vmatpush3.bf16.msra.mxu1 %v4246_v29 }
  0x20   : > { %3228 = vmatprep.subr.bf16.mxu0 %v4038_v1  ;;  %3704 = vmatprep.subr.bf16.mxu1 %v4038_v1 }
  0x23   : > { %3229 = vmatpush3.bf16.msra.mxu0 %v3941_v8  ;;  %3712 = vmatpush3.bf16.msra.mxu1 %v4253_v30 }
  0x24   : > { %3258 = vmatprep.subr.bf16.mxu0 %v4038_v1  ;;  %3705 = vmatprep.subr.bf16.mxu1 %v4038_v1 }
  0x26   : > { %3231 = vmatmul.mubr.bf16.vlgmr.msra.gmra.mrb[0].mxu0 %v3942_v9  ;;  %v3969_v9 = vld [vmem:[%s4933_s4 + $0x10] sm:$0xff]  }
  0x27   : > { %3234 = vmatprep.mubr.msk.bf16.mxu0 %vm4039_vm0, %v4038_v1  ;;  %3259 = vmatpush3.bf16.msra.mxu0 %v3949_v10 }
  0x28   : > { %3260 = vmatprep.subr.bf16.mxu0 %v4038_v1  ;;  %3713 = vmatpush3.bf16.msra.mxu1 %v4260_v31 }
  0x29   : > { %3434 = vmatprep.subr.bf16.mxu1 %v4038_v1 }
  0x2b   : > { %3261 = vmatpush3.bf16.msra.mxu0 %v3950_v11 }
  0x2c   : > { %3262 = vmatprep.subr.bf16.mxu0 %v4038_v1 }
  0x2e   : > { %3235 = vmatmul.mubr.bf16.gmra.mrb[4].mxu0 %v3943_v12 }
  0x2f   : > { %3238 = vmatprep.mubr.msk.bf16.mxu0 %vm4039_vm0, %v4038_v1  ;;  %3263 = vmatpush3.bf16.msra.mxu0 %v3951_v13 }
  0x30   : > { %3264 = vmatprep.subr.bf16.mxu0 %v4038_v1 }
  0x33   : > { %3265 = vmatpush3.bf16.msra.mxu0 %v3952_v14 }
  0x34   : > { %3266 = vmatprep.subr.bf16.mxu0 %v4038_v1 }
  0x36   : > { %3239 = vmatmul.mubr.bf16.gmra.mrb[8].mxu0 %v3944_v15 }
  0x37   : > { %3242 = vmatprep.mubr.msk.bf16.mxu0 %vm4039_vm0, %v4038_v1  ;;  %3267 = vmatpush3.bf16.msra.mxu0 %v3953_v20 }
  0x38   : > { %3268 = vmatprep.subr.bf16.mxu0 %v4038_v1 }
  0x3b   : > { %3269 = vmatpush3.bf16.msra.mxu0 %v3954_v21 }
  0x3c   : > { %3270 = vmatprep.subr.bf16.mxu0 %v4038_v1 }
  0x3e   : > { %3243 = vmatmul.mubr.bf16.gmra.mrb[12].mxu0 %v3945_v16 }
  0x3f   : > { %3246 = vmatprep.mubr.msk.bf16.mxu0 %vm4039_vm0, %v4038_v1  ;;  %3271 = vmatpush3.bf16.msra.mxu0 %v3955_v22 }
  0x40   : > { %3272 = vmatprep.subr.bf16.mxu0 %v4038_v1 }
  0x43   : > { %3273 = vmatpush3.bf16.msra.mxu0 %v3957_v24 }
  0x44   : > { %3302 = vmatprep.subr.bf16.mxu0 %v4038_v1 }
  0x46   : > { %3247 = vmatmul.mubr.bf16.gmra.mrb[16].mxu0 %v3946_v17  ;;  %v3971_v17 = vld [vmem:[%s4933_s4 + $0x18] sm:$0xff]  }
  0x47   : > { %3250 = vmatprep.mubr.msk.bf16.mxu0 %vm4039_vm0, %v4038_v1 }
  0x4e   : > { %3251 = vmatmul.mubr.bf16.gmra.mrb[20].mxu0 %v3947_v18 }
  0x4f   : > { %3254 = vmatprep.mubr.msk.bf16.mxu0 %vm4039_vm0, %v4038_v1 }
  0x56   : > { %3255 = vmatmul.mubr.bf16.gmra.mrb[24].mxu0 %v3948_v19 }
  0x57   : > { %3274 = vmatprep.mubr.msk.bf16.mxu0 %vm4039_vm0, %v4038_v1 }
  0xf9   : > { %v512_v33 = vpop.f32.mrb[0].mxu0 }
  0xfa   : > { %v573_v35 = vmul.f32 %v4267_v32, %v512_v33  ;;  %v3232_v36 = vpop.f32.mrb[1].mxu0 }
  0xfb   : > { %v515_v37 = vpop.f32.mrb[2].mxu0 }
  0xfc   : > { %v593_v38 = vadd.f32 %v4272_v34, %v573_v35  ;;  %v574_v39 = vmul.f32 %v4267_v32, %v515_v37  ;;  %v3233_v40 = vpop.f32.mrb[3].mxu0  ;;  %v3973_v35 = vld [vmem:[%s4933_s4 + $0x20] sm:$0xff]  }
  0xfe   : > { %v606_v41 = vmax.f32 %v593_v38, 0.0  ;;  %v594_v42 = vadd.f32 %v4272_v34, %v574_v39 }
 0x100   : > { %636 = vst [vmem:[#allocation2 + $0x10] sm:$0xff] %v606_v41  ;;  %v607_v43 = vmax.f32 %v594_v42, 0.0 }
 0x101   : > { %v520_v44 = vpop.f32.mrb[4].mxu0 }
 0x102   : > { %637 = vst [vmem:[#allocation2 + $0x18] sm:$0xff] %v607_v43  ;;  %v575_v45 = vmul.f32 %v4267_v32, %v520_v44  ;;  %v3236_v46 = vpop.f32.mrb[5].mxu0  ;;  %v4279_v47 = vpack.c.bf16 %v607_v43, %v606_v41  ;;  %v3975_v43 = vld [vmem:[%s4933_s4 + $0x28] sm:$0xff]  }
 0x103   : > { %v523_v48 = vpop.f32.mrb[6].mxu0 }
 0x104   : > { %v595_v49 = vadd.f32 %v4272_v34, %v575_v45  ;;  %v576_v50 = vmul.f32 %v4267_v32, %v523_v48  ;;  %v3237_v51 = vpop.f32.mrb[7].mxu0 }
 0x106   : > { %v608_v53 = vmax.f32 %v595_v49, 0.0  ;;  %v596_v54 = vadd.f32 %v4272_v34, %v576_v50 }
 0x107   : > { %v686_v55 = vld [vmem:[#allocation2 + $0xe] sm:$0xff] }
 0x108   : > { %638 = vst [vmem:[#allocation2 + $0x20] sm:$0xff] %v608_v53  ;;  %v609_v57 = vmax.f32 %v596_v54, 0.0  ;;  %v698_v58 = vpack.c.bf16 %v686_v55, %v685_v52  ;;  %v3977_v52 = vld [vmem:[%s4933_s4 + $0x30] sm:$0xff]  }
 0x109   : > { %v528_v59 = vpop.f32.mrb[8].mxu0  ;;  %v687_v7 = vld [vmem:[#allocation2 + $0x16] sm:$0xff] }
 0x10a   : > { %639 = vst [vmem:[#allocation2 + $0x28] sm:$0xff] %v609_v57  ;;  %v577_v60 = vmul.f32 %v4267_v32, %v528_v59  ;;  %v3240_v61 = vpop.f32.mrb[9].mxu0  ;;  %3275 = vmatmul.mubr.bf16.vlgmr.msra.gmra.mrb[28].mxu0 %v698_v58  ;;  %v4288_v62 = vpack.c.bf16 %v609_v57, %v608_v53  ;;  %v3966_v58 = vld [vmem:[%s4933_s4 + $0x100] sm:$0xff]  }
 0x10b   : > { %v531_v63 = vpop.f32.mrb[10].mxu0  ;;  %3278 = vmatprep.mubr.msk.bf16.mxu0 %vm4039_vm0, %v4038_v1  ;;  %3303 = vmatpush3.bf16.msra.mxu0 %v3965_v56 }
 0x10c   : > { %v597_v2 = vadd.f32 %v4272_v34, %v577_v60  ;;  %v578_v3 = vmul.f32 %v4267_v32, %v531_v63  ;;  %v3241_v4 = vpop.f32.mrb[11].mxu0  ;;  %3304 = vmatprep.subr.bf16.mxu0 %v4038_v1 }
 0x10e   : > { %v610_v5 = vmax.f32 %v597_v2, 0.0  ;;  %v598_v6 = vadd.f32 %v4272_v34, %v578_v3  ;;  %v3979_v2 = vld [vmem:[%s4933_s4 + $0x38] sm:$0xff]  }
 0x10f   : > { %v688_v8 = vld [vmem:[#allocation2 + $0x1e] sm:$0xff]  ;;  %3305 = vmatpush3.bf16.msra.mxu0 %v3967_v0 }
 0x110   : > { %640 = vst [vmem:[#allocation2 + $0x30] sm:$0xff] %v610_v5  ;;  %v611_v10 = vmax.f32 %v598_v6, 0.0  ;;  %v699_v11 = vpack.c.bf16 %v688_v8, %v687_v7  ;;  %3306 = vmatprep.subr.bf16.mxu0 %v4038_v1  ;;  %v3968_v6 = vld [vmem:[%s4933_s4 + $0x108] sm:$0xff]  }
 0x111   : > { %v536_v12 = vpop.f32.mrb[12].mxu0  ;;  %v689_v24 = vld [vmem:[#allocation2 + $0x26] sm:$0xff] }
 0x112   : > { %641 = vst [vmem:[#allocation2 + $0x38] sm:$0xff] %v611_v10  ;;  %v579_v13 = vmul.f32 %v4267_v32, %v536_v12  ;;  %v3244_v14 = vpop.f32.mrb[13].mxu0  ;;  %3279 = vmatmul.mubr.bf16.gmra.mrb[32].mxu0 %v699_v11  ;;  %v4304_v15 = vpack.c.bf16 %v611_v10, %v610_v5 }
 0x113   : > { %v539_v16 = vpop.f32.mrb[14].mxu0  ;;  %3282 = vmatprep.mubr.msk.bf16.mxu0 %vm4039_vm0, %v4038_v1  ;;  %3307 = vmatpush3.bf16.msra.mxu0 %v3969_v9 }
 0x114   : > { %v599_v18 = vadd.f32 %v4272_v34, %v579_v13  ;;  %v580_v19 = vmul.f32 %v4267_v32, %v539_v16  ;;  %v3245_v20 = vpop.f32.mrb[15].mxu0  ;;  %3308 = vmatprep.subr.bf16.mxu0 %v4038_v1 }
 0x116   : > { %v612_v21 = vmax.f32 %v599_v18, 0.0  ;;  %v600_v22 = vadd.f32 %v4272_v34, %v580_v19  ;;  %v3970_v18 = vld [vmem:[%s4933_s4 + $0x110] sm:$0xff]  }
 0x117   : > { %v690_v33 = vld [vmem:[#allocation2 + $0x2e] sm:$0xff]  ;;  %3309 = vmatpush3.bf16.msra.mxu0 %v3971_v17 }
 0x118   : > { %642 = vst [vmem:[#allocation2 + $0x40] sm:$0xff] %v612_v21  ;;  %v613_v36 = vmax.f32 %v600_v22, 0.0  ;;  %v700_v37 = vpack.c.bf16 %v690_v33, %v689_v24  ;;  %3310 = vmatprep.subr.bf16.mxu0 %v4038_v1 }
 0x119   : > { %v544_v38 = vpop.f32.mrb[16].mxu0  ;;  %v691_v50 = vld [vmem:[#allocation2 + $0x36] sm:$0xff] }
 0x11a   : > { %643 = vst [vmem:[#allocation2 + $0x48] sm:$0xff] %v613_v36  ;;  %v581_v39 = vmul.f32 %v4267_v32, %v544_v38  ;;  %v3248_v40 = vpop.f32.mrb[17].mxu0  ;;  %3283 = vmatmul.mubr.bf16.gmra.mrb[36].mxu0 %v700_v37  ;;  %v4320_v41 = vpack.c.bf16 %v613_v36, %v612_v21 }
 0x11b   : > { %v547_v42 = vpop.f32.mrb[18].mxu0  ;;  %3286 = vmatprep.mubr.msk.bf16.mxu0 %vm4039_vm0, %v4038_v1  ;;  %3311 = vmatpush3.bf16.msra.mxu0 %v3973_v35 }
 0x11c   : > { %v601_v44 = vadd.f32 %v4272_v34, %v581_v39  ;;  %v582_v45 = vmul.f32 %v4267_v32, %v547_v42  ;;  %v3249_v46 = vpop.f32.mrb[19].mxu0  ;;  %3312 = vmatprep.subr.bf16.mxu0 %v4038_v1 }
 0x11e   : > { %v614_v48 = vmax.f32 %v601_v44, 0.0  ;;  %v602_v49 = vadd.f32 %v4272_v34, %v582_v45  ;;  %v3976_v45 = vld [vmem:[%s4933_s4 + $0x128] sm:$0xff]  }
 0x11f   : > { %v692_v51 = vld [vmem:[#allocation2 + $0x3e] sm:$0xff]  ;;  %3313 = vmatpush3.bf16.msra.mxu0 %v3975_v43 }
 0x120   : > { %644 = vst [vmem:[#allocation2 + $0x50] sm:$0xff] %v614_v48  ;;  %v615_v53 = vmax.f32 %v602_v49, 0.0  ;;  %v701_v54 = vpack.c.bf16 %v692_v51, %v691_v50  ;;  %3314 = vmatprep.subr.bf16.mxu0 %v4038_v1  ;;  %v4335_v56 = vld [vmem:[#allocation2 + $0x3f] sm:$0xff]  ;;  %v3978_v50 = vld [vmem:[%s4933_s4 + $0x130] sm:$0xff]  }
 0x121   : > { %v552_v55 = vpop.f32.mrb[20].mxu0  ;;  %v4337_v57 = vld [vmem:[#allocation2 + $0x47] sm:$0xff] }
 0x122   : > { %645 = vst [vmem:[#allocation2 + $0x58] sm:$0xff] %v615_v53  ;;  %v583_v59 = vmul.f32 %v4267_v32, %v552_v55  ;;  %v3252_v60 = vpop.f32.mrb[21].mxu0  ;;  %3287 = vmatmul.mubr.bf16.gmra.mrb[40].mxu0 %v701_v54  ;;  %v1196_v61 = vpack.c.bf16 %v4337_v57, %v4335_v56  ;;  %v4345_v63 = vpack.c.bf16 %v615_v53, %v614_v48  ;;  %v693_v9 = vld [vmem:[#allocation2 + $0x46] sm:$0xff] }
 0x123   : > { %v555_v0 = vpop.f32.mrb[22].mxu0  ;;  %3290 = vmatprep.mubr.msk.bf16.mxu0 %vm4039_vm0, %v4038_v1  ;;  %3315 = vmatpush3.bf16.msra.mxu0 %v3977_v52  ;;  %v3974_v43 = vld [vmem:[%s4933_s4 + $0x120] sm:$0xff]   ;;  %v3980_v52 = vld [vmem:[%s4933_s4 + $0x138] sm:$0xff]   ;;  %v650_v54 = vld [vmem:[#allocation2 + $0xd] sm:$0xff] }
 0x124   : > { %v603_v3 = vadd.f32 %v4272_v34, %v583_v59  ;;  %v584_v4 = vmul.f32 %v4267_v32, %v555_v0  ;;  %v3253_v5 = vpop.f32.mrb[23].mxu0  ;;  %3419 = vmatmul.mubr.bf16.vlgmr.msra.gmra.mrb[0].mxu1 %v1196_v61  ;;  %3316 = vmatprep.subr.bf16.mxu0 %v4038_v1  ;;  %v649_v53 = vld [vmem:[#allocation2 + $0x5] sm:$0xff]  ;;  %v652_v61 = vld [vmem:[#allocation2 + $0x1d] sm:$0xff] }
 0x125   : > { %3435 = vmatpush3.bf16.msra.mxu1 %v3966_v58  ;;  %3422 = vmatprep.mubr.msk.bf16.mxu1 %vm4039_vm0, %v4038_v1  ;;  %v3985_v55 = vld [vmem:[%s4933_s4 + $0x80] sm:$0xff]   ;;  %v662_v58 = vpack.c.bf16 %v650_v54, %v649_v53  ;;  %v3986_v60 = vld [vmem:[%s4933_s4 + $0x88] sm:$0xff]   ;;  %v3989_v5 = vld [vmem:[%s4933_s4 + $0x98] sm:$0xff]  }
 0x126   : > { %v616_v7 = vmax.f32 %v603_v3, 0.0  ;;  %v604_v8 = vadd.f32 %v4272_v34, %v584_v4  ;;  %3436 = vmatprep.subr.bf16.mxu1 %v4038_v1  ;;  %v3981_v59 = vld [vmem:[%s4933_s4 + $0x140] sm:$0xff]   ;;  %v3982_v0 = vld [vmem:[%s4933_s4 + $0x148] sm:$0xff]   ;;  %v3988_v3 = vld [vmem:[%s4933_s4 + $0x90] sm:$0xff]  }
 0x127   : > { %v694_v10 = vld [vmem:[#allocation2 + $0x4e] sm:$0xff]  ;;  %3317 = vmatpush3.bf16.msra.mxu0 %v3979_v2  ;;  %v4546_v54 = vld [vmem:[#allocation2 + $0x21] sm:$0xff] }
 0x128   : > { %v4362_v11 = vld [vmem:[#allocation2 + $0x4f] sm:$0xff]  ;;  %646 = vst [vmem:[#allocation2 + $0x60] sm:$0xff] %v616_v7  ;;  %v617_v12 = vmax.f32 %v604_v8, 0.0  ;;  %v702_v13 = vpack.c.bf16 %v694_v10, %v693_v9  ;;  %3346 = vmatprep.subr.bf16.mxu0 %v4038_v1  ;;  %v653_v8 = vld [vmem:[#allocation2 + $0x25] sm:$0xff] }
 0x129   : > { %v1011_v14 = vpack.c.bf16 %v4362_v11, %v4337_v57  ;;  %3437 = vmatpush3.bf16.msra.mxu1 %v3968_v6  ;;  %v560_v16 = vpop.f32.mrb[24].mxu0  ;;  %v4367_v17 = vld [vmem:[#allocation2 + $0x57] sm:$0xff]  ;;  %v4450_v6 = vld [vmem:[#allocation2] sm:$0xff]  ;;  %v4540_v53 = vld [vmem:[#allocation2 + $0x29] sm:$0xff] }
 0x12a   : > { %647 = vst [vmem:[#allocation2 + $0x68] sm:$0xff] %v617_v12  ;;  %v585_v19 = vmul.f32 %v4267_v32, %v560_v16  ;;  %v3256_v20 = vpop.f32.mrb[25].mxu0  ;;  %3291 = vmatmul.mubr.bf16.gmra.mrb[44].mxu0 %v702_v13  ;;  %3438 = vmatprep.subr.bf16.mxu1 %v4038_v1  ;;  %v1197_v21 = vpack.c.bf16 %v4367_v17, %v4362_v11  ;;  %v3972_v32 = vld [vmem:[%s4933_s4 + $0x118] sm:$0xff]   ;;  %v3983_v4 = vld [vmem:[%s4933_s4 + $0x150] sm:$0xff]   ;;  %v3987_v10 = vld [vmem:[%s4933_s4 + $0x160] sm:$0xff]  }
 0x12b   : > { %v4376_v22 = vpack.c.bf16 %v617_v12, %v616_v7  ;;  %v563_v24 = vpop.f32.mrb[26].mxu0  ;;  %3294 = vmatprep.mubr.msk.bf16.mxu0 %vm4039_vm0, %v4038_v1  ;;  %v695_v37 = vld [vmem:[#allocation2 + $0x56] sm:$0xff]  ;;  %v654_v7 = vld [vmem:[#allocation2 + $0x2d] sm:$0xff] }
 0x12c   : > { %v605_v33 = vadd.f32 %v4272_v34, %v585_v19  ;;  %v3257_v35 = vpop.f32.mrb[27].mxu0  ;;  %3423 = vmatmul.mubr.bf16.gmra.mrb[4].mxu1 %v1197_v21  ;;  %v651_v2 = vld [vmem:[#allocation2 + $0x15] sm:$0xff]  ;;  %v664_v9 = vpack.c.bf16 %v654_v7, %v653_v8  ;;  %v3993_v12 = vld [vmem:[%s4933_s4 + $0xa8] sm:$0xff]   ;;  %v656_v13 = vld [vmem:[#allocation2 + $0x3d] sm:$0xff] }
 0x12d   : > { %3439 = vmatpush3.bf16.msra.mxu1 %v3970_v18  ;;  %3426 = vmatprep.mubr.msk.bf16.mxu1 %vm4039_vm0, %v4038_v1  ;;  %v3990_v16 = vld [vmem:[%s4933_s4 + $0x168] sm:$0xff]   ;;  %v655_v18 = vld [vmem:[#allocation2 + $0x35] sm:$0xff] }
 0x12e   : > { %v618_v36 = vmax.f32 %v605_v33, 0.0  ;;  %3440 = vmatprep.subr.bf16.mxu1 %v4038_v1  ;;  %v3994_v19 = vld [vmem:[%s4933_s4 + $0xb0] sm:$0xff]   ;;  %v3996_v21 = vld [vmem:[%s4933_s4 + $0xb8] sm:$0xff]   ;;  %v657_v35 = vld [vmem:[#allocation2 + $0x45] sm:$0xff] }
 0x12f   : > { %v696_v38 = vld [vmem:[#allocation2 + $0x5e] sm:$0xff]  ;;  %v3992_v20 = vld [vmem:[%s4933_s4 + $0x170] sm:$0xff]  }
 0x130   : > { %v4387_v39 = vld [vmem:[#allocation2 + $0x5f] sm:$0xff]  ;;  %648 = vst [vmem:[#allocation2 + $0x70] sm:$0xf] %v618_v36  ;;  %v703_v40 = vpack.c.bf16 %v696_v38, %v695_v37  ;;  %v658_v24 = vld [vmem:[#allocation2 + $0x4d] sm:$0xff]  ;;  %v659_v36 = vld [vmem:[#allocation2 + $0x55] sm:$0xff] }
 0x131   : > { %v1012_v34 = vpack.c.bf16 %v4387_v39, %v4367_v17  ;;  %3441 = vmatpush3.bf16.msra.mxu1 %v3972_v32  ;;  %v1191_v42 = vld [vmem:[#allocation2 + $0x67] sm:$0xff]  ;;  %v3995_v33 = vld [vmem:[%s4933_s4 + $0x178] sm:$0xff]   ;;  %v666_v32 = vpack.c.bf16 %v658_v24, %v657_v35  ;;  %v4003_v7 = vld [vmem:[%s4933_s4 + $0x1b0] sm:$0xff]  }
 0x132   : > { %3295 = vmatmul.mubr.bf16.gmra.mrb[48].mxu0 %v703_v40  ;;  %3442 = vmatprep.subr.bf16.mxu1 %v4038_v1  ;;  %v1198_v44 = vpack.c.bf16 %v1191_v42, %v4387_v39  ;;  %v697_v46 = vld [vmem:[#allocation2 + $0x66] sm:$0xf] }
 0x133   : > { %3298 = vmatprep.mubr.msk.bf16.mxu0 %vm4039_vm0, %v4038_v1  ;;  %v704_v49 = vpack.c.bf16 %v697_v46, %v697_v46  ;;  %v661_v38 = vld [vmem:[#allocation2 + $0x65] sm:$0xf]  ;;  %v1552_v46 = vld [vmem:[#allocation2 + $0x11] sm:$0xff] }
 0x134   : > { %3427 = vmatmul.mubr.bf16.gmra.mrb[8].mxu1 %v1198_v44  ;;  %v668_v42 = vpack.c.bf16 %v661_v38, %v661_v38  ;;  %v4515_v44 = vld [vmem:[#allocation2 + $0xf] sm:$0xff]  ;;  %v1006_v11 = vld [vmem:[#allocation2 + $0x67] sm:$0xf]  ;;  %v1750_v38 = vld [vmem:[#allocation2 + $0x79] sm:$0xf] }
 0x135   : > { %3443 = vmatpush3.bf16.msra.mxu1 %v3974_v43  ;;  %3430 = vmatprep.mubr.msk.bf16.mxu1 %vm4039_vm0, %v4038_v1  ;;  %v994_v43 = vld [vmem:[#allocation2 + $0x7] sm:$0xff] }
 0x136   : > { %3444 = vmatprep.subr.bf16.mxu1 %v4038_v1  ;;  %v4005_v39 = vld [vmem:[%s4933_s4 + $0x1c0] sm:$0xff]   ;;  %v4010_v24 = vld [vmem:[%s4933_s4 + $0x1e8] sm:$0xff]  }
 0x137   : > { %v1192_v48 = vld [vmem:[#allocation2 + $0x6f] sm:$0xf] }
 0x138   : > { %v1199_v51 = vpack.c.bf16 %v1192_v48, %v1192_v48  ;;  %v1378_v40 = vld [vmem:[#allocation2 + $0x70] sm:$0xf]  ;;  %v3997_v48 = vld [vmem:[%s4933_s4 + $0x180] sm:$0xff]  }
 0x139   : > { %3445 = vmatpush3.bf16.msra.mxu1 %v3976_v45  ;;  %v4519_v45 = vld [vmem:[#allocation2 + $0x19] sm:$0xff] }
 0x13a   : > { %3299 = vmatmul.mubr.bf16.gmra.mrb[52].mxu0 %v704_v49  ;;  %3446 = vmatprep.subr.bf16.mxu1 %v4038_v1  ;;  %v1565_v49 = vpack.c.bf16 %v4519_v45, %v1552_v46  ;;  %v1926_v46 = vld [vmem:[#allocation2 + $0x2a] sm:$0xff] }
 0x13b   : > { %3318 = vmatprep.mubr.msk.bf16.mxu0 %vm4039_vm0, %v4038_v1 }
 0x13c   : > { %3431 = vmatmul.mubr.bf16.gmra.mrb[12].mxu1 %v1199_v51  ;;  %v3998_v51 = vld [vmem:[%s4933_s4 + $0x188] sm:$0xff]  }
 0x13d   : > { %3447 = vmatpush3.bf16.msra.mxu1 %v3978_v50  ;;  %3450 = vmatprep.mubr.msk.bf16.mxu1 %vm4039_vm0, %v4038_v1  ;;  %v4530_v50 = vld [vmem:[#allocation2 + $0x1f] sm:$0xff] }
 0x13e   : > { %3448 = vmatprep.subr.bf16.mxu1 %v4038_v1 }
 0x141   : > { %3449 = vmatpush3.bf16.msra.mxu1 %v3980_v52  ;;  %v4538_v52 = vld [vmem:[#allocation2 + $0x17] sm:$0xff] }
 0x142   : > { %3319 = vmatmul.mubr.bf16.vlgmr.msra.gmra.mrb[28].mxu0 %v662_v58  ;;  %3478 = vmatprep.subr.bf16.mxu1 %v4038_v1  ;;  %v1566_v58 = vpack.c.bf16 %v4540_v53, %v4546_v54  ;;  %v1193_v17 = vpack.c.bf16 %v4538_v52, %v4515_v44 }
 0x143   : > { %3322 = vmatprep.mubr.msk.bf16.mxu0 %vm4039_vm0, %v4038_v1  ;;  %3347 = vmatpush3.bf16.msra.mxu0 %v3985_v55  ;;  %v3999_v55 = vld [vmem:[%s4933_s4 + $0x190] sm:$0xff]  }
 0x144   : > { %3451 = vmatmul.mubr.bf16.vlgmr.msra.gmra.mrb[16].mxu1 %v4279_v47  ;;  %3348 = vmatprep.subr.bf16.mxu0 %v4038_v1  ;;  %v663_v47 = vpack.c.bf16 %v652_v61, %v651_v2  ;;  %v4568_v61 = vld [vmem:[#allocation2 + $0x39] sm:$0xff] }
 0x145   : > { %3479 = vmatpush3.bf16.msra.mxu1 %v3981_v59  ;;  %3454 = vmatprep.mubr.msk.bf16.mxu1 %vm4039_vm0, %v4038_v1  ;;  %v4000_v59 = vld [vmem:[%s4933_s4 + $0x198] sm:$0xff]   ;;  %v4001_v2 = vld [vmem:[%s4933_s4 + $0x1a0] sm:$0xff]  }
 0x146   : > { %3480 = vmatprep.subr.bf16.mxu1 %v4038_v1 }
 0x147   : > { %3349 = vmatpush3.bf16.msra.mxu0 %v3986_v60  ;;  %v4566_v60 = vld [vmem:[#allocation2 + $0x27] sm:$0xff] }
 0x148   : > { %3350 = vmatprep.subr.bf16.mxu0 %v4038_v1 }
 0x149   : > { %3481 = vmatpush3.bf16.msra.mxu1 %v3982_v0  ;;  %v4574_v0 = vld [vmem:[#allocation2 + $0x31] sm:$0xff] }
 0x14a   : > { %3323 = vmatmul.mubr.bf16.gmra.mrb[32].mxu0 %v663_v47  ;;  %3482 = vmatprep.subr.bf16.mxu1 %v4038_v1  ;;  %v4592_v47 = vld [vmem:[#allocation2 + $0x37] sm:$0xff] }
 0x14b   : > { %3326 = vmatprep.mubr.msk.bf16.mxu0 %vm4039_vm0, %v4038_v1  ;;  %3351 = vmatpush3.bf16.msra.mxu0 %v3988_v3  ;;  %v3984_v1 = vld [vmem:[%s4933_s4 + $0x158] sm:$0xff]   ;;  %v1567_v3 = vpack.c.bf16 %v4568_v61, %v4574_v0 }
 0x14c   : > { %3455 = vmatmul.mubr.bf16.gmra.mrb[20].mxu1 %v4288_v62  ;;  %3352 = vmatprep.subr.bf16.mxu0 %v4450_v6  ;;  %v3991_v62 = vld [vmem:[%s4933_s4 + $0xa0] sm:$0xff]  }
 0x14d   : > { %3483 = vmatpush3.bf16.msra.mxu1 %v3983_v4  ;;  %3458 = vmatprep.mubr.msk.bf16.mxu1 %vm4039_vm0, %v4450_v6  ;;  %v4594_v4 = vld [vmem:[#allocation2 + $0x49] sm:$0xff] }
 0x14e   : > { %3484 = vmatprep.subr.bf16.mxu1 %v4450_v6 }
 0x14f   : > { %3353 = vmatpush3.bf16.msra.mxu0 %v3989_v5  ;;  %v4600_v5 = vld [vmem:[#allocation2 + $0x41] sm:$0xff] }
 0x150   : > { %3354 = vmatprep.subr.bf16.mxu0 %v4450_v6 }
 0x151   : > { %3485 = vmatpush3.bf16.msra.mxu1 %v3984_v1  ;;  %v1568_v1 = vpack.c.bf16 %v4594_v4, %v4600_v5 }
 0x152   : > { %3327 = vmatmul.mubr.bf16.gmra.mrb[36].mxu0 %v664_v9  ;;  %3486 = vmatprep.subr.bf16.mxu1 %v4450_v6  ;;  %v1013_v9 = vpack.c.bf16 %v1006_v11, %v1006_v11  ;;  %v2115_v11 = vld [vmem:[#allocation2 + $0x43] sm:$0xff] }
 0x153   : > { %3330 = vmatprep.mubr.msk.bf16.mxu0 %vm4039_vm0, %v4450_v6  ;;  %3355 = vmatpush3.bf16.msra.mxu0 %v3991_v62  ;;  %v1562_v62 = vld [vmem:[#allocation2 + $0x61] sm:$0xff] }
 0x154   : > { %3459 = vmatmul.mubr.bf16.gmra.mrb[24].mxu1 %v4304_v15  ;;  %3356 = vmatprep.subr.bf16.mxu0 %v4450_v6  ;;  %v665_v15 = vpack.c.bf16 %v656_v13, %v655_v18  ;;  %v1194_v13 = vpack.c.bf16 %v4566_v60, %v4530_v50  ;;  %v1752_v18 = vpack.c.bf16 %v4574_v0, %v4540_v53  ;;  %v4017_v53 = vld [vmem:[%s4933_s4 + $0x220] sm:$0xff]  }
 0x155   : > { %3462 = vmatprep.mubr.msk.bf16.mxu1 %vm4039_vm0, %v4450_v6  ;;  %3487 = vmatpush3.bf16.msra.mxu1 %v3987_v10 }
 0x156   : > { %3488 = vmatprep.subr.bf16.mxu1 %v4450_v6 }
 0x157   : > { %3357 = vmatpush3.bf16.msra.mxu0 %v3993_v12  ;;  %v4006_v12 = vld [vmem:[%s4933_s4 + $0x1c8] sm:$0xff]  }
 0x158   : > { %3358 = vmatprep.subr.bf16.mxu0 %v4450_v6 }
 0x159   : > { %3489 = vmatpush3.bf16.msra.mxu1 %v3990_v16  ;;  %v4007_v16 = vld [vmem:[%s4933_s4 + $0x1d0] sm:$0xff]  }
 0x15a   : > { %3331 = vmatmul.mubr.bf16.gmra.mrb[40].mxu0 %v665_v15  ;;  %3490 = vmatprep.subr.bf16.mxu1 %v4450_v6 }
 0x15b   : > { %3334 = vmatprep.mubr.msk.bf16.mxu0 %vm4039_vm0, %v4450_v6  ;;  %3359 = vmatpush3.bf16.msra.mxu0 %v3994_v19  ;;  %v4008_v19 = vld [vmem:[%s4933_s4 + $0x1d8] sm:$0xff]  }
 0x15c   : > { %3463 = vmatmul.mubr.bf16.gmra.mrb[0].mxu1 %v4320_v41  ;;  %3360 = vmatprep.subr.bf16.mxu0 %v4450_v6  ;;  %v660_v41 = vld [vmem:[#allocation2 + $0x5d] sm:$0xff] }
 0x15d   : > { %3466 = vmatprep.mubr.msk.bf16.mxu1 %vm4039_vm0, %v4450_v6  ;;  %3491 = vmatpush3.bf16.msra.mxu1 %v3992_v20  ;;  %v667_v37 = vpack.c.bf16 %v660_v41, %v659_v36  ;;  %v4009_v20 = vld [vmem:[%s4933_s4 + $0x1e0] sm:$0xff]   ;;  %v1749_v36 = vld [vmem:[#allocation2 + $0x71] sm:$0xff] }
 0x15e   : > { %3492 = vmatprep.subr.bf16.mxu1 %v4450_v6 }
 0x15f   : > { %3361 = vmatpush3.bf16.msra.mxu0 %v3996_v21  ;;  %v1753_v21 = vpack.c.bf16 %v4600_v5, %v4568_v61  ;;  %v1933_v61 = vld [vmem:[#allocation2 + $0x62] sm:$0xff] }
 0x160   : > { %3390 = vmatprep.subr.bf16.mxu0 %v4450_v6  ;;  %v4022_v5 = vld [vmem:[%s4936_s7 + $0x8] sm:$0xff]  }
 0x161   : > { %3493 = vmatpush3.bf16.msra.mxu1 %v3995_v33  ;;  %v4011_v33 = vld [vmem:[%s4933_s4 + $0x1f0] sm:$0xff]  }
 0x162   : > { %3335 = vmatmul.mubr.bf16.gmra.mrb[44].mxu0 %v666_v32  ;;  %3522 = vmatprep.subr.bf16.mxu1 %v4450_v6  ;;  %v4012_v32 = vld [vmem:[%s4933_s4 + $0x1f8] sm:$0xff]  }
 0x163   : > { %3338 = vmatprep.mubr.msk.bf16.mxu0 %vm4039_vm0, %v4450_v6 }
 0x164   : > { %3467 = vmatmul.mubr.bf16.gmra.mrb[4].mxu1 %v4345_v63  ;;  %v1385_v63 = vpack.c.bf16 %v1378_v40, %v1378_v40  ;;  %v1757_v40 = vpack.c.bf16 %v1750_v38, %v1750_v38 }
 0x165   : > { %3470 = vmatprep.mubr.msk.bf16.mxu1 %vm4039_vm0, %v4450_v6 }
 0x16a   : > { %3339 = vmatmul.mubr.bf16.gmra.mrb[48].mxu0 %v667_v37 }
 0x16b   : > { %3342 = vmatprep.mubr.msk.bf16.mxu0 %vm4039_vm0, %v4450_v6 }
 0x16c   : > { %3471 = vmatmul.mubr.bf16.gmra.mrb[8].mxu1 %v4376_v22  ;;  %v1007_v22 = vpack.c.bf16 %v4515_v44, %v994_v43  ;;  %v4013_v43 = vld [vmem:[%s4933_s4 + $0x200] sm:$0xff]  }
 0x16d   : > { %3474 = vmatprep.mubr.msk.bf16.mxu1 %vm4039_vm0, %v4450_v6 }
 0x172   : > { %3343 = vmatmul.mubr.bf16.gmra.mrb[52].mxu0 %v668_v42  ;;  %v1925_v42 = vld [vmem:[#allocation2 + $0x22] sm:$0xff] }
 0x173   : > { %3362 = vmatprep.mubr.msk.bf16.mxu0 %vm4039_vm0, %v4450_v6 }
 0x174   : > { %3475 = vmatmul.mubr.bf16.gmra.mrb[12].mxu1 %v1385_v63  ;;  %v1924_v63 = vld [vmem:[#allocation2 + $0x1a] sm:$0xff] }
 0x175   : > { %3494 = vmatprep.mubr.msk.bf16.mxu1 %vm4039_vm0, %v4450_v6  ;;  %v1937_v44 = vpack.c.bf16 %v1925_v42, %v1924_v63 }
 0x17a   : > { %3363 = vmatmul.mubr.bf16.vlgmr.msra.gmra.mrb[28].mxu0 %v1007_v22  ;;  %v1927_v22 = vld [vmem:[#allocation2 + $0x32] sm:$0xff] }
 0x17b   : > { %3366 = vmatprep.mubr.msk.bf16.mxu0 %vm4039_vm0, %v4450_v6  ;;  %3391 = vmatpush3.bf16.msra.mxu0 %v4206_v23  ;;  %v1008_v23 = vpack.c.bf16 %v4530_v50, %v4538_v52  ;;  %v4016_v50 = vld [vmem:[%s4933_s4 + $0x218] sm:$0xff]  }
 0x17c   : > { %3495 = vmatmul.mubr.bf16.vlgmr.msra.gmra.mrb[16].mxu1 %v1565_v49  ;;  %3392 = vmatprep.subr.bf16.mxu0 %v4450_v6  ;;  %v1938_v49 = vpack.c.bf16 %v1927_v22, %v1926_v46  ;;  %v1928_v52 = vld [vmem:[#allocation2 + $0x3a] sm:$0xff] }
 0x17d   : > { %3523 = vmatpush3.bf16.msra.mxu1 %v3997_v48  ;;  %3498 = vmatprep.mubr.msk.bf16.mxu1 %vm4039_vm0, %v4450_v6  ;;  %v4015_v48 = vld [vmem:[%s4933_s4 + $0x210] sm:$0xff]  }
 0x17e   : > { %3524 = vmatprep.subr.bf16.mxu1 %v4450_v6 }
 0x17f   : > { %3393 = vmatpush3.bf16.msra.mxu0 %v4217_v25  ;;  %v4558_v25 = vld [vmem:[#allocation2 + $0x2f] sm:$0xff] }
 0x180   : > { %3394 = vmatprep.subr.bf16.mxu0 %v4450_v6  ;;  %v1195_v15 = vpack.c.bf16 %v4592_v47, %v4558_v25 }
 0x181   : > { %3525 = vmatpush3.bf16.msra.mxu1 %v3998_v51  ;;  %v1929_v51 = vld [vmem:[#allocation2 + $0x42] sm:$0xff] }
 0x182   : > { %3367 = vmatmul.mubr.bf16.gmra.mrb[32].mxu0 %v1008_v23  ;;  %3526 = vmatprep.subr.bf16.mxu1 %v4450_v6  ;;  %v1939_v23 = vpack.c.bf16 %v1929_v51, %v1928_v52 }
 0x183   : > { %3370 = vmatprep.mubr.msk.bf16.mxu0 %vm4039_vm0, %v4450_v6  ;;  %3395 = vmatpush3.bf16.msra.mxu0 %v4225_v26  ;;  %v1009_v26 = vpack.c.bf16 %v4558_v25, %v4566_v60  ;;  %v4019_v25 = vld [vmem:[%s4933_s4 + $0x230] sm:$0xff]   ;;  %v4020_v60 = vld [vmem:[%s4933_s4 + $0x238] sm:$0xff]  }
 0x184   : > { %3499 = vmatmul.mubr.bf16.gmra.mrb[20].mxu1 %v1566_v58  ;;  %3396 = vmatprep.subr.bf16.mxu0 %v4450_v6  ;;  %v1930_v58 = vld [vmem:[#allocation2 + $0x4a] sm:$0xff] }
 0x185   : > { %3527 = vmatpush3.bf16.msra.mxu1 %v3999_v55  ;;  %3502 = vmatprep.mubr.msk.bf16.mxu1 %vm4039_vm0, %v4450_v6  ;;  %v1931_v55 = vld [vmem:[#allocation2 + $0x52] sm:$0xff] }
 0x186   : > { %3528 = vmatprep.subr.bf16.mxu1 %v4450_v6 }
 0x187   : > { %3397 = vmatpush3.bf16.msra.mxu0 %v4232_v27  ;;  %v4002_v27 = vld [vmem:[%s4933_s4 + $0x1a8] sm:$0xff]  }
 0x188   : > { %3398 = vmatprep.subr.bf16.mxu0 %v4450_v6 }
 0x189   : > { %3529 = vmatpush3.bf16.msra.mxu1 %v4000_v59  ;;  %v1940_v59 = vpack.c.bf16 %v1931_v55, %v1930_v58 }
 0x18a   : > { %3371 = vmatmul.mubr.bf16.gmra.mrb[36].mxu0 %v1009_v26  ;;  %3530 = vmatprep.subr.bf16.mxu1 %v4450_v6  ;;  %v1932_v26 = vld [vmem:[#allocation2 + $0x5a] sm:$0xff] }
 0x18b   : > { %3374 = vmatprep.mubr.msk.bf16.mxu0 %vm4039_vm0, %v4450_v6  ;;  %3399 = vmatpush3.bf16.msra.mxu0 %v4239_v28  ;;  %v1010_v28 = vpack.c.bf16 %v4335_v56, %v4592_v47  ;;  %v4618_v56 = vld [vmem:[#allocation2 + $0x59] sm:$0xff]  ;;  %v1941_v0 = vpack.c.bf16 %v1933_v61, %v1932_v26 }
 0x18c   : > { %3503 = vmatmul.mubr.bf16.gmra.mrb[24].mxu1 %v1567_v3  ;;  %3400 = vmatprep.subr.bf16.mxu0 %v4450_v6  ;;  %v1755_v41 = vpack.c.bf16 %v1562_v62, %v4618_v56  ;;  %v1935_v3 = vld [vmem:[#allocation2 + $0x72] sm:$0xff]  ;;  %v1936_v47 = vld [vmem:[#allocation2 + $0x7a] sm:$0xf] }
 0x18d   : > { %3506 = vmatprep.mubr.msk.bf16.mxu1 %vm4039_vm0, %v4450_v6  ;;  %3531 = vmatpush3.bf16.msra.mxu1 %v4001_v2  ;;  %v1934_v2 = vld [vmem:[#allocation2 + $0x6a] sm:$0xff] }
 0x18e   : > { %3532 = vmatprep.subr.bf16.mxu1 %v4450_v6 }
 0x18f   : > { %3401 = vmatpush3.bf16.msra.mxu0 %v4246_v29  ;;  %v4004_v29 = vld [vmem:[%s4933_s4 + $0x1b8] sm:$0xff]  }
 0x190   : > { %3402 = vmatprep.subr.bf16.mxu0 %v4450_v6 }
 0x191   : > { %3533 = vmatpush3.bf16.msra.mxu1 %v4002_v27  ;;  %v1942_v27 = vpack.c.bf16 %v1935_v3, %v1934_v2 }
 0x192   : > { %3375 = vmatmul.mubr.bf16.gmra.mrb[40].mxu0 %v1010_v28  ;;  %3534 = vmatprep.subr.bf16.mxu1 %v4450_v6  ;;  %v4021_v28 = vld [vmem:[%s4936_s7] sm:$0xff]  }
 0x193   : > { %3378 = vmatprep.mubr.msk.bf16.mxu0 %vm4039_vm0, %v4450_v6  ;;  %3403 = vmatpush3.bf16.msra.mxu0 %v4253_v30  ;;  %v1560_v30 = vld [vmem:[#allocation2 + $0x51] sm:$0xff] }
 0x194   : > { %3507 = vmatmul.mubr.bf16.gmra.mrb[0].mxu1 %v1568_v1  ;;  %3404 = vmatprep.subr.bf16.mxu0 %v4450_v6  ;;  %v1569_v8 = vpack.c.bf16 %v4618_v56, %v1560_v30  ;;  %v1754_v35 = vpack.c.bf16 %v1560_v30, %v4594_v4  ;;  %v1943_v4 = vpack.c.bf16 %v1936_v47, %v1936_v47  ;;  %v2111_v1 = vld [vmem:[#allocation2 + $0x23] sm:$0xff]  ;;  %v4024_v30 = vld [vmem:[%s4936_s7 + $0x18] sm:$0xff]  }
 0x195   : > { %3510 = vmatprep.mubr.msk.bf16.mxu1 %vm4039_vm0, %v4450_v6  ;;  %3535 = vmatpush3.bf16.msra.mxu1 %v4003_v7  ;;  %v4023_v7 = vld [vmem:[%s4936_s7 + $0x10] sm:$0xff]  }
 0x196   : > { %3536 = vmatprep.subr.bf16.mxu1 %v4450_v6 }
 0x197   : > { %3405 = vmatpush3.bf16.msra.mxu0 %v4260_v31  ;;  %v4631_v31 = vld [vmem:[#allocation2 + $0x69] sm:$0xff] }
 0x198   : > { %3654 = vmatprep.subr.bf16.mxu0 %v4450_v6  ;;  %v1570_v57 = vpack.c.bf16 %v4631_v31, %v1562_v62  ;;  %v1756_v37 = vpack.c.bf16 %v1749_v36, %v4631_v31  ;;  %v2113_v31 = vld [vmem:[#allocation2 + $0x33] sm:$0xff]  ;;  %v2112_v62 = vld [vmem:[#allocation2 + $0x2b] sm:$0xff] }
 0x199   : > { %3537 = vmatpush3.bf16.msra.mxu1 %v4004_v29  ;;  %v2110_v29 = vld [vmem:[#allocation2 + $0x1b] sm:$0xff] }
 0x19a   : > { %3379 = vmatmul.mubr.bf16.gmra.mrb[44].mxu0 %v1011_v14  ;;  %3566 = vmatprep.subr.bf16.mxu1 %v4450_v6  ;;  %v1564_v14 = vld [vmem:[#allocation2 + $0x71] sm:$0xf]  ;;  %v2123_v56 = vpack.c.bf16 %v2111_v1, %v2110_v29 }
 0x19b   : > { %3382 = vmatprep.mubr.msk.bf16.mxu0 %vm4039_vm0, %v4450_v6  ;;  %v1571_v10 = vpack.c.bf16 %v1564_v14, %v1564_v14  ;;  %v2114_v14 = vld [vmem:[#allocation2 + $0x3b] sm:$0xff] }
 0x19c   : > { %3511 = vmatmul.mubr.bf16.gmra.mrb[4].mxu1 %v1569_v8  ;;  %v4025_v8 = vld [vmem:[%s4936_s7 + $0x20] sm:$0xff]  }
 0x19d   : > { %3514 = vmatprep.mubr.msk.bf16.mxu1 %vm4039_vm0, %v4450_v6 }
 0x1a2   : > { %3383 = vmatmul.mubr.bf16.gmra.mrb[48].mxu0 %v1012_v34  ;;  %v1751_v34 = vpack.c.bf16 %v4546_v54, %v4519_v45  ;;  %v4014_v45 = vld [vmem:[%s4933_s4 + $0x208] sm:$0xff]  }
 0x1a3   : > { %3386 = vmatprep.mubr.msk.bf16.mxu0 %vm4039_vm0, %v4450_v6  ;;  %v4018_v54 = vld [vmem:[%s4933_s4 + $0x228] sm:$0xff]  }
 0x1a4   : > { %3515 = vmatmul.mubr.bf16.gmra.mrb[8].mxu1 %v1570_v57  ;;  %v2124_v57 = vpack.c.bf16 %v2113_v31, %v2112_v62 }
 0x1a5   : > { %3518 = vmatprep.mubr.msk.bf16.mxu1 %vm4039_vm0, %v4450_v6 }
 0x1aa   : > { %3387 = vmatmul.mubr.bf16.gmra.mrb[52].mxu0 %v1013_v9  ;;  %v2125_v9 = vpack.c.bf16 %v2115_v11, %v2114_v14 }
 0x1ab   : > { %3406 = vmatprep.mubr.msk.bf16.mxu0 %vm4039_vm0, %v4450_v6 }
 0x1ac   : > { %3519 = vmatmul.mubr.bf16.gmra.mrb[12].mxu1 %v1571_v10  ;;  %v2117_v10 = vld [vmem:[#allocation2 + $0x53] sm:$0xff] }
 0x1ad   : > { %3538 = vmatprep.mubr.msk.bf16.mxu1 %vm4039_vm0, %v4450_v6 }
 0x1b2   : > { %3407 = vmatmul.mubr.bf16.vlgmr.msra.gmra.mrb[28].mxu0 %v1193_v17  ;;  %v2116_v17 = vld [vmem:[#allocation2 + $0x4b] sm:$0xff] }
 0x1b3   : > { %3410 = vmatprep.mubr.msk.bf16.mxu0 %vm4039_vm0, %v4450_v6  ;;  %3655 = vmatpush3.bf16.msra.mxu0 %v4021_v28 }
 0x1b4   : > { %3539 = vmatmul.mubr.bf16.vlgmr.msra.gmra.mrb[16].mxu1 %v1751_v34  ;;  %3656 = vmatprep.subr.bf16.mxu0 %v4450_v6  ;;  %v2119_v34 = vld [vmem:[#allocation2 + $0x63] sm:$0xff] }
 0x1b5   : > { %3567 = vmatpush3.bf16.msra.mxu1 %v4005_v39  ;;  %3542 = vmatprep.mubr.msk.bf16.mxu1 %vm4039_vm0, %v4450_v6  ;;  %v2126_v39 = vpack.c.bf16 %v2117_v10, %v2116_v17 }
 0x1b6   : > { %3568 = vmatprep.subr.bf16.mxu1 %v4450_v6 }
 0x1b7   : > { %3657 = vmatpush3.bf16.msra.mxu0 %v4022_v5 }
 0x1b8   : > { %3658 = vmatprep.subr.bf16.mxu0 %v4450_v6 }
 0x1b9   : > { %3569 = vmatpush3.bf16.msra.mxu1 %v4006_v12  ;;  %v2118_v12 = vld [vmem:[#allocation2 + $0x5b] sm:$0xff] }
 0x1ba   : > { %3411 = vmatmul.mubr.bf16.gmra.mrb[32].mxu0 %v1194_v13  ;;  %3570 = vmatprep.subr.bf16.mxu1 %v4450_v6  ;;  %v2127_v13 = vpack.c.bf16 %v2119_v34, %v2118_v12 }
 0x1bb   : > { %3414 = vmatprep.mubr.msk.bf16.mxu0 %vm4039_vm0, %v4450_v6  ;;  %3659 = vmatpush3.bf16.msra.mxu0 %v4023_v7 }
 0x1bc   : > { %3543 = vmatmul.mubr.bf16.gmra.mrb[20].mxu1 %v1752_v18  ;;  %3660 = vmatprep.subr.bf16.mxu0 %v4450_v6  ;;  %v2121_v18 = vld [vmem:[#allocation2 + $0x73] sm:$0xff] }
 0x1bd   : > { %3571 = vmatpush3.bf16.msra.mxu1 %v4007_v16  ;;  %3546 = vmatprep.mubr.msk.bf16.mxu1 %vm4039_vm0, %v4450_v6  ;;  %v2120_v16 = vld [vmem:[#allocation2 + $0x6b] sm:$0xff] }
 0x1be   : > { %3572 = vmatprep.subr.bf16.mxu1 %v4450_v6 }
 0x1bf   : > { %3661 = vmatpush3.bf16.msra.mxu0 %v4024_v30 }
 0x1c0   : > { %3662 = vmatprep.subr.bf16.mxu0 %v4450_v6 }
 0x1c1   : > { %3573 = vmatpush3.bf16.msra.mxu1 %v4008_v19  ;;  %v2128_v19 = vpack.c.bf16 %v2121_v18, %v2120_v16 }
 0x1c2   : > { %3415 = vmatmul.mubr.bf16.gmra.mrb[36].mxu0 %v1195_v15  ;;  %3574 = vmatprep.subr.bf16.mxu1 %v4450_v6  ;;  %v2122_v15 = vld [vmem:[#allocation2 + $0x7b] sm:$0xf] }
 0x1c3   : > { %3670 = vmatprep.mubr.msk.bf16.mxu0 %vm4039_vm0, %v4450_v6  ;;  %3663 = vmatpush3.bf16.msra.mxu0 %v4025_v8 }
 0x1c4   : > { %3547 = vmatmul.mubr.bf16.gmra.mrb[24].mxu1 %v1753_v21  ;;  %3664 = vmatprep.subr.bf16.mxu0 %v4450_v6 }
 0x1c5   : > { %3550 = vmatprep.mubr.msk.bf16.mxu1 %vm4039_vm0, %v4450_v6  ;;  %3575 = vmatpush3.bf16.msra.mxu1 %v4009_v20  ;;  %v2129_v20 = vpack.c.bf16 %v2122_v15, %v2122_v15 }
 0x1c6   : > { %3576 = vmatprep.subr.bf16.mxu1 %v4450_v6 }
 0x1c9   : > { %3577 = vmatpush3.bf16.msra.mxu1 %v4010_v24 }
 0x1ca   : > { %3578 = vmatprep.subr.bf16.mxu1 %v4450_v6 }
 0x1cc   : > { %3551 = vmatmul.mubr.bf16.gmra.mrb[0].mxu1 %v1754_v35 }
 0x1cd   : > { %3554 = vmatprep.mubr.msk.bf16.mxu1 %vm4039_vm0, %v4450_v6  ;;  %3579 = vmatpush3.bf16.msra.mxu1 %v4011_v33 }
 0x1ce   : > { %3580 = vmatprep.subr.bf16.mxu1 %v4450_v6 }
 0x1d1   : > { %3581 = vmatpush3.bf16.msra.mxu1 %v4012_v32 }
 0x1d2   : > { %3610 = vmatprep.subr.bf16.mxu1 %v4450_v6 }
 0x1d4   : > { %3555 = vmatmul.mubr.bf16.gmra.mrb[4].mxu1 %v1755_v41 }
 0x1d5   : > { %3558 = vmatprep.mubr.msk.bf16.mxu1 %vm4039_vm0, %v4450_v6 }
 0x1dc   : > { %3559 = vmatmul.mubr.bf16.gmra.mrb[8].mxu1 %v1756_v37 }
 0x1dd   : > { %3562 = vmatprep.mubr.msk.bf16.mxu1 %vm4039_vm0, %v4450_v6 }
 0x1e4   : > { %3563 = vmatmul.mubr.bf16.gmra.mrb[12].mxu1 %v1757_v40 }
 0x1e5   : > { %3582 = vmatprep.mubr.msk.bf16.mxu1 %vm4039_vm0, %v4450_v6 }
 0x1ec   : > { %3583 = vmatmul.mubr.bf16.vlgmr.msra.gmra.mrb[16].mxu1 %v1937_v44 }
 0x1ed   : > { %3611 = vmatpush3.bf16.msra.mxu1 %v4013_v43  ;;  %3586 = vmatprep.mubr.msk.bf16.mxu1 %vm4039_vm0, %v4450_v6  ;;  %v4026_v43 = vld [vmem:[%s4936_s7 + $0x28] sm:$0xff]  }
 0x1ee   : > { %3612 = vmatprep.subr.bf16.mxu1 %v4450_v6  ;;  %3665 = vmatpush3.bf16.msra.mxu0 %v4026_v43 }
 0x1ef   : > { %3666 = vmatprep.subr.bf16.mxu0 %v4450_v6 }
 0x1f1   : > { %3613 = vmatpush3.bf16.msra.mxu1 %v4014_v45  ;;  %v4027_v45 = vld [vmem:[%s4936_s7 + $0x30] sm:$0xff]  }
 0x1f2   : > { %3614 = vmatprep.subr.bf16.mxu1 %v4450_v6  ;;  %3667 = vmatpush3.bf16.msra.mxu0 %v4027_v45 }
 0x1f3   : > { %3668 = vmatprep.subr.bf16.mxu0 %v4450_v6 }
 0x1f4   : > { %3587 = vmatmul.mubr.bf16.gmra.mrb[20].mxu1 %v1938_v49  ;;  %v4028_v49 = vld [vmem:[%s4936_s7 + $0x38] sm:$0xff]  }
 0x1f5   : > { %3615 = vmatpush3.bf16.msra.mxu1 %v4015_v48  ;;  %3590 = vmatprep.mubr.msk.bf16.mxu1 %vm4039_vm0, %v4450_v6 }
 0x1f6   : > { %3616 = vmatprep.subr.bf16.mxu1 %v4450_v6  ;;  %3669 = vmatpush3.bf16.msra.mxu0 %v4028_v49 }
 0x1f9   : > { %3617 = vmatpush3.bf16.msra.mxu1 %v4016_v50 }
 0x1fa   : > { %3618 = vmatprep.subr.bf16.mxu1 %v4450_v6 }
 0x1fc   : > { %3591 = vmatmul.mubr.bf16.gmra.mrb[24].mxu1 %v1939_v23 }
 0x1fd   : > { %3594 = vmatprep.mubr.msk.bf16.mxu1 %vm4039_vm0, %v4450_v6  ;;  %3619 = vmatpush3.bf16.msra.mxu1 %v4017_v53 }
 0x1fe   : > { %3620 = vmatprep.subr.bf16.mxu1 %v4450_v6 }
 0x201   : > { %3621 = vmatpush3.bf16.msra.mxu1 %v4018_v54 }
 0x202   : > { %3622 = vmatprep.subr.bf16.mxu1 %v4450_v6 }
 0x204   : > { %3595 = vmatmul.mubr.bf16.gmra.mrb[0].mxu1 %v1940_v59 }
 0x205   : > { %3598 = vmatprep.mubr.msk.bf16.mxu1 %vm4039_vm0, %v4450_v6  ;;  %3623 = vmatpush3.bf16.msra.mxu1 %v4019_v25 }
 0x206   : > { %3624 = vmatprep.subr.bf16.mxu1 %v4450_v6 }
 0x209   : > { %3625 = vmatpush3.bf16.msra.mxu1 %v4020_v60 }
 0x20c   : > { %3599 = vmatmul.mubr.bf16.gmra.mrb[4].mxu1 %v1941_v0  ;;  %v4817_v0 = vld [vmem:[%s4934_s5] ss:$0 sm:$0xff] }
 0x20d   : > { %3602 = vmatprep.mubr.msk.bf16.mxu1 %vm4039_vm0, %v4450_v6 }
 0x214   : > { %3603 = vmatmul.mubr.bf16.gmra.mrb[8].mxu1 %v1942_v27  ;;  %v4822_v27 = vld [vmem:[%s4935_s6] ss:$0 sm:$0xff] }
 0x215   : > { %3606 = vmatprep.mubr.msk.bf16.mxu1 %vm4039_vm0, %v4450_v6 }
 0x21c   : > { %3607 = vmatmul.mubr.bf16.gmra.mrb[12].mxu1 %v1943_v4 }
 0x21d   : > { %3626 = vmatprep.mubr.msk.bf16.mxu1 %vm4039_vm0, %v4450_v6 }
 0x224   : > { %3627 = vmatmul.mubr.bf16.vlgmr.msra.gmra.mrb[16].mxu1 %v2123_v56 }
 0x225   : > { %3630 = vmatprep.mubr.msk.bf16.mxu1 %vm4039_vm0, %v4450_v6 }
 0x22c   : > { %3631 = vmatmul.mubr.bf16.gmra.mrb[20].mxu1 %v2124_v57 }
 0x22d   : > { %3634 = vmatprep.mubr.msk.bf16.mxu1 %vm4039_vm0, %v4450_v6 }
 0x234   : > { %3635 = vmatmul.mubr.bf16.gmra.mrb[24].mxu1 %v2125_v9 }
 0x235   : > { %3638 = vmatprep.mubr.msk.bf16.mxu1 %vm4039_vm0, %v4450_v6 }
 0x23c   : > { %3639 = vmatmul.mubr.bf16.gmra.mrb[0].mxu1 %v2126_v39 }
 0x23d   : > { %3642 = vmatprep.mubr.msk.bf16.mxu1 %vm4039_vm0, %v4450_v6 }
 0x244   : > { %3643 = vmatmul.mubr.bf16.gmra.mrb[4].mxu1 %v2127_v13 }
 0x245   : > { %3646 = vmatprep.mubr.msk.bf16.mxu1 %vm4039_vm0, %v4450_v6 }
 0x24c   : > { %3647 = vmatmul.mubr.bf16.gmra.mrb[8].mxu1 %v2128_v19 }
 0x24d   : > { %3650 = vmatprep.mubr.msk.bf16.mxu1 %vm4039_vm0, %v4450_v6 }
 0x254   : > { %3651 = vmatmul.mubr.bf16.gmra.mrb[12].mxu1 %v2129_v20 }
 0x265   : > { %v4789_v21 = vpop.f32.mrb[40].mxu0 }
 0x266   : > { %v3376_v24 = vpop.f32.mrb[41].mxu0 }
 0x267   : > { %v4791_v33 = vpop.f32.mrb[42].mxu0 }
 0x268   : > { %v3377_v35 = vpop.f32.mrb[43].mxu0 }
 0x26d   : > { %v4793_v32 = vpop.f32.mrb[44].mxu0 }
 0x26e   : > { %v3380_v41 = vpop.f32.mrb[45].mxu0 }
 0x26f   : > { %v4795_v36 = vpop.f32.mrb[46].mxu0 }
 0x270   : > { %v3381_v37 = vpop.f32.mrb[47].mxu0 }
 0x275   : > { %v4797_v38 = vpop.f32.mrb[48].mxu0 }
 0x276   : > { %v3384_v40 = vpop.f32.mrb[49].mxu0 }
 0x277   : > { %v4799_v42 = vpop.f32.mrb[50].mxu0 }
 0x278   : > { %v3385_v63 = vpop.f32.mrb[51].mxu0 }
 0x27d   : > { %v4805_v44 = vpop.f32.mrb[52].mxu0 }
 0x27e   : > { %v3388_v22 = vpop.f32.mrb[53].mxu0 }
 0x27f   : > { %v1164_v46 = vpop.f32.mrb[54].mxu0 }
 0x280   : > { %v3389_v48 = vpop.f32.mrb[55].mxu0 }
 0x285   : > { %v1299_v50 = vpop.f32.mrb[28].mxu0 }
 0x286   : > { %v3408_v51 = vpop.f32.mrb[29].mxu0 }
 0x287   : > { %v1302_v52 = vpop.f32.mrb[30].mxu0 }
 0x288   : > { %v3409_v53 = vpop.f32.mrb[31].mxu0 }
 0x28d   : > { %v1307_v23 = vpop.f32.mrb[32].mxu0 }
 0x28e   : > { %v3412_v54 = vpop.f32.mrb[33].mxu0 }
 0x28f   : > { %v1310_v55 = vpop.f32.mrb[34].mxu0 }
 0x290   : > { %v3413_v58 = vpop.f32.mrb[35].mxu0 }
 0x295   : > { %v1315_v25 = vpop.f32.mrb[36].mxu0 }
 0x296   : > { %v3416_v59 = vpop.f32.mrb[37].mxu0 }
 0x297   : > { %v1318_v60 = vpop.f32.mrb[38].mxu0 }
 0x298   : > { %v3417_v61 = vpop.f32.mrb[39].mxu0 }
 0x2f7   : > { %v2229_v26 = vpop.f32.mrb[16].mxu1 }
 0x2f8   : > { %v3714_v2 = vadd.f32 %v2229_v26, %v1299_v50  ;;  %v3628_v3 = vpop.f32.mrb[17].mxu1 }
 0x2f9   : > { %v2232_v47 = vpop.f32.mrb[18].mxu1 }
 0x2fa   : > { %v2303_v4 = vmul.f32 %v3714_v2, %v4817_v0  ;;  %v3715_v28 = vadd.f32 %v2232_v47, %v1302_v52  ;;  %v3629_v5 = vpop.f32.mrb[19].mxu1 }
 0x2fc   : > { %v2323_v7 = vadd.f32 %v4822_v27, %v2303_v4  ;;  %v2304_v1 = vmul.f32 %v3715_v28, %v4817_v0 }
 0x2fe   : > { %v2324_v29 = vadd.f32 %v4822_v27, %v2304_v1  ;;  %v2336_v30 = vmax.f32 %v2323_v7, 0.0 }
 0x2ff   : > { %v2237_v56 = vpop.f32.mrb[20].mxu1 }
 0x300   : > { %v2337_v8 = vmax.f32 %v2324_v29, 0.0  ;;  %v3716_v31 = vadd.f32 %v2237_v56, %v1307_v23  ;;  %v3632_v62 = vpop.f32.mrb[21].mxu1 }
 0x301   : > { %v2240_v57 = vpop.f32.mrb[22].mxu1 }
 0x302   : > { %v2349_v11 = vpack.c.bf16 %v2337_v8, %v2336_v30  ;;  %v2305_v14 = vmul.f32 %v3716_v31, %v4817_v0  ;;  %v3717_v9 = vadd.f32 %v2240_v57, %v1310_v55  ;;  %v3633_v10 = vpop.f32.mrb[23].mxu1 }
 0x304   : > { %v2325_v17 = vadd.f32 %v4822_v27, %v2305_v14  ;;  %v2306_v39 = vmul.f32 %v3717_v9, %v4817_v0  ;;  %3671 = vmatmul.mubr.bf16.vlgmr.msra.gmra.mrb[56].mxu0 %v2349_v11 }
 0x305   : > { %3674 = vmatprep.mubr.msk.bf16.mxu0 %vm4039_vm0, %v4450_v6 }
 0x306   : > { %v2326_v34 = vadd.f32 %v4822_v27, %v2306_v39  ;;  %v2338_v13 = vmax.f32 %v2325_v17, 0.0 }
 0x307   : > { %v2245_v12 = vpop.f32.mrb[24].mxu1 }
 0x308   : > { %v2339_v16 = vmax.f32 %v2326_v34, 0.0  ;;  %v3718_v18 = vadd.f32 %v2245_v12, %v1315_v25  ;;  %v3636_v19 = vpop.f32.mrb[25].mxu1 }
 0x309   : > { %v2248_v15 = vpop.f32.mrb[26].mxu1  ;;  %v2986_v19 = vld [vmem:[%s4132_s24] sm:$0xff]  }
 0x30a   : > { %v2307_v20 = vmul.f32 %v3718_v18, %v4817_v0  ;;  %v3719_v24 = vadd.f32 %v2248_v15, %v1318_v60  ;;  %v3637_v35 = vpop.f32.mrb[27].mxu1  ;;  %v2350_v41 = vpack.c.bf16 %v2339_v16, %v2338_v13 }
 0x30c   : > { %v2327_v37 = vadd.f32 %v4822_v27, %v2307_v20  ;;  %v2308_v40 = vmul.f32 %v3719_v24, %v4817_v0  ;;  %3675 = vmatmul.mubr.bf16.gmra.mrb[60].mxu0 %v2350_v41  ;;  %v2987_v20 = vunpack.c.l.bf16 %v2986_v19 }
 0x30d   : > { %3678 = vmatprep.mubr.msk.bf16.mxu0 %vm4039_vm0, %v4450_v6 }
 0x30e   : > { %v2328_v63 = vadd.f32 %v4822_v27, %v2308_v40  ;;  %v2340_v45 = vmax.f32 %v2327_v37, 0.0  ;;  %v2988_v37 = vunpack.c.h.bf16 %v2986_v19 }
 0x30f   : > { %v2253_v43 = vpop.f32.mrb[0].mxu1 }
 0x310   : > { %v2341_v22 = vmax.f32 %v2328_v63, 0.0  ;;  %v3720_v46 = vadd.f32 %v2253_v43, %v4789_v21  ;;  %v3640_v48 = vpop.f32.mrb[1].mxu1 }
 0x311   : > { %v2256_v49 = vpop.f32.mrb[2].mxu1 }
 0x312   : > { %v2309_v50 = vmul.f32 %v3720_v46, %v4817_v0  ;;  %v3721_v51 = vadd.f32 %v2256_v49, %v4791_v33  ;;  %v3641_v52 = vpop.f32.mrb[3].mxu1  ;;  %v2351_v53 = vpack.c.bf16 %v2341_v22, %v2340_v45  ;;  %v3039_v45 = vld [vmem:[%s4132_s24 + $0x8] sm:$0xff]  }
 0x314   : > { %v2329_v23 = vadd.f32 %v4822_v27, %v2309_v50  ;;  %v2310_v54 = vmul.f32 %v3721_v51, %v4817_v0  ;;  %3679 = vmatmul.mubr.bf16.gmra.mrb[64].mxu0 %v2351_v53  ;;  %v2991_v51 = vunpack.c.l.bf16 %v3039_v45 }
 0x315   : > { %3682 = vmatprep.mubr.msk.bf16.mxu0 %vm4039_vm0, %v4450_v6 }
 0x316   : > { %v2330_v55 = vadd.f32 %v4822_v27, %v2310_v54  ;;  %v2342_v21 = vmax.f32 %v2329_v23, 0.0 }
 0x317   : > { %v2261_v58 = vpop.f32.mrb[4].mxu1 }
 0x318   : > { %v2343_v25 = vmax.f32 %v2330_v55, 0.0  ;;  %v3722_v59 = vadd.f32 %v2261_v58, %v4793_v32  ;;  %v3644_v60 = vpop.f32.mrb[5].mxu1  ;;  %v2992_v58 = vunpack.c.h.bf16 %v3039_v45 }
 0x319   : > { %v2264_v61 = vpop.f32.mrb[6].mxu1  ;;  %v3040_v60 = vld [vmem:[%s4132_s24 + $0x10] sm:$0xff]  }
 0x31a   : > { %v2311_v33 = vmul.f32 %v3722_v59, %v4817_v0  ;;  %v3723_v26 = vadd.f32 %v2264_v61, %v4795_v36  ;;  %v3645_v2 = vpop.f32.mrb[7].mxu1  ;;  %v2352_v3 = vpack.c.bf16 %v2343_v25, %v2342_v21 }
 0x31c   : > { %v2331_v47 = vadd.f32 %v4822_v27, %v2311_v33  ;;  %v2312_v4 = vmul.f32 %v3723_v26, %v4817_v0  ;;  %3683 = vmatmul.mubr.bf16.gmra.mrb[68].mxu0 %v2352_v3 }
 0x31d   : > { %3686 = vmatprep.mubr.msk.bf16.mxu0 %vm4039_vm0, %v4450_v6 }
 0x31e   : > { %v2332_v28 = vadd.f32 %v4822_v27, %v2312_v4  ;;  %v2344_v32 = vmax.f32 %v2331_v47, 0.0  ;;  %v2995_v47 = vunpack.c.l.bf16 %v3040_v60 }
 0x31f   : > { %v2269_v5 = vpop.f32.mrb[8].mxu1 }
 0x320   : > { %v2345_v7 = vmax.f32 %v2332_v28, 0.0  ;;  %v3724_v1 = vadd.f32 %v2269_v5, %v4797_v38  ;;  %v3648_v29 = vpop.f32.mrb[9].mxu1 }
 0x321   : > { %v2272_v56 = vpop.f32.mrb[10].mxu1 }
 0x322   : > { %v2313_v36 = vmul.f32 %v3724_v1, %v4817_v0  ;;  %v3725_v30 = vadd.f32 %v2272_v56, %v4799_v42  ;;  %v3649_v8 = vpop.f32.mrb[11].mxu1  ;;  %v2353_v31 = vpack.c.bf16 %v2345_v7, %v2344_v32  ;;  %v2996_v1 = vunpack.c.h.bf16 %v3040_v60 }
 0x324   : > { %v2333_v62 = vadd.f32 %v4822_v27, %v2313_v36  ;;  %v2314_v57 = vmul.f32 %v3725_v30, %v4817_v0  ;;  %3687 = vmatmul.mubr.bf16.gmra.mrb[72].mxu0 %v2353_v31  ;;  %v3041_v30 = vld [vmem:[%s4132_s24 + $0x18] sm:$0xff]  }
 0x325   : > { %3690 = vmatprep.mubr.msk.bf16.mxu0 %vm4039_vm0, %v4450_v6 }
 0x326   : > { %v2334_v11 = vadd.f32 %v4822_v27, %v2314_v57  ;;  %v2346_v38 = vmax.f32 %v2333_v62, 0.0 }
 0x327   : > { %v2277_v14 = vpop.f32.mrb[12].mxu1 }
 0x328   : > { %v2347_v9 = vmax.f32 %v2334_v11, 0.0  ;;  %v3726_v10 = vadd.f32 %v2277_v14, %v4805_v44  ;;  %v3652_v17 = vpop.f32.mrb[13].mxu1  ;;  %v4872_v44 = vld [vmem:[%s4937_s8] ss:$0 sm:$0xff]  ;;  %v2999_v14 = vunpack.c.l.bf16 %v3041_v30 }
 0x329   : > { %v2280_v42 = vpop.f32.mrb[14].mxu1 }
 0x32a   : > { %v2315_v39 = vmul.f32 %v3726_v10, %v4817_v0  ;;  %v3653_v34 = vpop.f32.mrb[15].mxu1  ;;  %v2354_v12 = vpack.c.bf16 %v2347_v9, %v2346_v38  ;;  %v4878_v0 = vld [vmem:[%s4938_s9] ss:$0 sm:$0xff] }
 0x32c   : > { %v2335_v13 = vadd.f32 %v4822_v27, %v2315_v39  ;;  %3691 = vmatmul.mubr.bf16.gmra.mrb[76].mxu0 %v2354_v12  ;;  %v3000_v39 = vunpack.c.h.bf16 %v3041_v30 }
 0x32d   : > { %3694 = vmatprep.mubr.msk.bf16.mxu0 %vm4039_vm0, %v4450_v6 }
 0x32e   : > { %v2348_v16 = vmax.f32 %v2335_v13, 0.0 }
 0x330   : > { %v2355_v18 = vpack.c.bf16 %v2348_v16, %v2348_v16  ;;  %v3042_v16 = vld [vmem:[%s4132_s24 + $0x20] sm:$0xff]  }
 0x334   : > { %3695 = vmatmul.mubr.bf16.gmra.mrb[80].mxu0 %v2355_v18 }
 0x3d7   : > { %v2454_v15 = vpop.f32.mrb[56].mxu0 }
 0x3d8   : > { %v2515_v27 = vmul.f32 %v4872_v44, %v2454_v15  ;;  %v3672_v6 = vpop.f32.mrb[57].mxu0 }
 0x3d9   : > { %v2457_v24 = vpop.f32.mrb[58].mxu0  ;;  %v3003_v6 = vunpack.c.l.bf16 %v3042_v16 }
 0x3da   : > { %v2535_v35 = vadd.f32 %v4878_v0, %v2515_v27  ;;  %v2516_v41 = vmul.f32 %v4872_v44, %v2457_v24  ;;  %v3673_v40 = vpop.f32.mrb[59].mxu0 }
 0x3dc   : > { %v2574_v63 = vadd.f32 %v2987_v20, %v2535_v35  ;;  %v2536_v43 = vadd.f32 %v4878_v0, %v2516_v41 }
 0x3de   : > { %v2575_v22 = vadd.f32 %v2988_v37, %v2536_v43  ;;  %v2587_v48 = vmax.f32 %v2574_v63, 0.0  ;;  %v3004_v63 = vunpack.c.h.bf16 %v3042_v16 }
 0x3df   : > { %v2462_v46 = vpop.f32.mrb[60].mxu0 }
 0x3e0   : > { %v2588_v49 = vmax.f32 %v2575_v22, 0.0  ;;  %v2517_v50 = vmul.f32 %v4872_v44, %v2462_v46  ;;  %v3676_v52 = vpop.f32.mrb[61].mxu0  ;;  %v3043_v46 = vld [vmem:[%s4132_s24 + $0x28] sm:$0xff]  }
 0x3e1   : > { %v2465_v53 = vpop.f32.mrb[62].mxu0 }
 0x3e2   : > { %v3012_v23 = vpack.c.bf16 %v2588_v49, %v2587_v48  ;;  %v2537_v54 = vadd.f32 %v4878_v0, %v2517_v50  ;;  %v2518_v55 = vmul.f32 %v4872_v44, %v2465_v53  ;;  %v3677_v21 = vpop.f32.mrb[63].mxu0  ;;  %v3007_v53 = vunpack.c.l.bf16 %v3043_v46 }
 0x3e4   : > { %3013 = vst [vmem:[%s4891_s15] sm:$0xff] %v3012_v23   ;;  %v2576_v25 = vadd.f32 %v2991_v51, %v2537_v54  ;;  %v2538_v59 = vadd.f32 %v4878_v0, %v2518_v55 }
 0x3e6   : > { %v2577_v61 = vadd.f32 %v2992_v58, %v2538_v59  ;;  %v2589_v26 = vmax.f32 %v2576_v25, 0.0  ;;  %v3008_v25 = vunpack.c.h.bf16 %v3043_v46 }
 0x3e7   : > { %v2470_v33 = vpop.f32.mrb[64].mxu0 }
 0x3e8   : > { %v2590_v2 = vmax.f32 %v2577_v61, 0.0  ;;  %v2519_v3 = vmul.f32 %v4872_v44, %v2470_v33  ;;  %v3680_v4 = vpop.f32.mrb[65].mxu0  ;;  %v2560_v33 = vld [vmem:[%s4132_s24 + $0x30] sm:$0x3] }
 0x3e9   : > { %v2473_v28 = vpop.f32.mrb[66].mxu0 }
 0x3ea   : > { %v3017_v5 = vpack.c.bf16 %v2590_v2, %v2589_v26  ;;  %v2539_v32 = vadd.f32 %v4878_v0, %v2519_v3  ;;  %v2520_v7 = vmul.f32 %v4872_v44, %v2473_v28  ;;  %v3681_v29 = vpop.f32.mrb[67].mxu0  ;;  %v2573_v28 = vunpack.c.l.bf16 %v2560_v33 }
 0x3ec   : > { %3044 = vst [vmem:[%s4891_s15 + $0x8] sm:$0xff] %v3017_v5   ;;  %v2578_v56 = vadd.f32 %v2995_v47, %v2539_v32  ;;  %v2540_v36 = vadd.f32 %v4878_v0, %v2520_v7 }
 0x3ee   : > { %v2579_v8 = vadd.f32 %v2996_v1, %v2540_v36  ;;  %v2591_v62 = vmax.f32 %v2578_v56, 0.0 }
 0x3ef   : > { %v2478_v31 = vpop.f32.mrb[68].mxu0 }
 0x3f0   : > { %v2592_v57 = vmax.f32 %v2579_v8, 0.0  ;;  %v2521_v11 = vmul.f32 %v4872_v44, %v2478_v31  ;;  %v3684_v38 = vpop.f32.mrb[69].mxu0 }
 0x3f1   : > { %v2481_v9 = vpop.f32.mrb[70].mxu0 }
 0x3f2   : > { %v3022_v10 = vpack.c.bf16 %v2592_v57, %v2591_v62  ;;  %v2541_v17 = vadd.f32 %v4878_v0, %v2521_v11  ;;  %v2522_v42 = vmul.f32 %v4872_v44, %v2481_v9  ;;  %v3685_v34 = vpop.f32.mrb[71].mxu0 }
 0x3f4   : > { %3045 = vst [vmem:[%s4891_s15 + $0x10] sm:$0xff] %v3022_v10   ;;  %v2580_v12 = vadd.f32 %v2999_v14, %v2541_v17  ;;  %v2542_v13 = vadd.f32 %v4878_v0, %v2522_v42 }
 0x3f6   : > { %v2581_v18 = vadd.f32 %v3000_v39, %v2542_v13  ;;  %v2593_v15 = vmax.f32 %v2580_v12, 0.0 }
 0x3f7   : > { %v2486_v19 = vpop.f32.mrb[72].mxu0 }
 0x3f8   : > { %v2594_v27 = vmax.f32 %v2581_v18, 0.0  ;;  %v2523_v20 = vmul.f32 %v4872_v44, %v2486_v19  ;;  %v3688_v24 = vpop.f32.mrb[73].mxu0 }
 0x3f9   : > { %v2489_v35 = vpop.f32.mrb[74].mxu0 }
 0x3fa   : > { %v3027_v41 = vpack.c.bf16 %v2594_v27, %v2593_v15  ;;  %v2543_v37 = vadd.f32 %v4878_v0, %v2523_v20  ;;  %v2524_v40 = vmul.f32 %v4872_v44, %v2489_v35  ;;  %v3689_v43 = vpop.f32.mrb[75].mxu0 }
 0x3fc   : > { %3046 = vst [vmem:[%s4891_s15 + $0x18] sm:$0xff] %v3027_v41   ;;  %v2582_v45 = vadd.f32 %v3003_v6, %v2543_v37  ;;  %v2544_v22 = vadd.f32 %v4878_v0, %v2524_v40 }
 0x3fe   : > { %v2583_v48 = vadd.f32 %v3004_v63, %v2544_v22  ;;  %v2595_v50 = vmax.f32 %v2582_v45, 0.0 }
 0x3ff   : > { %v2494_v49 = vpop.f32.mrb[76].mxu0 }
 0x400   : > { %v2596_v51 = vmax.f32 %v2583_v48, 0.0  ;;  %v2525_v52 = vmul.f32 %v4872_v44, %v2494_v49  ;;  %v3692_v23 = vpop.f32.mrb[77].mxu0 }
 0x401   : > { %v2497_v54 = vpop.f32.mrb[78].mxu0 }
 0x402   : > { %v3032_v55 = vpack.c.bf16 %v2596_v51, %v2595_v50  ;;  %v2545_v58 = vadd.f32 %v4878_v0, %v2525_v52  ;;  %v2526_v21 = vmul.f32 %v4872_v44, %v2497_v54  ;;  %v3693_v59 = vpop.f32.mrb[79].mxu0 }
 0x404   : > { %3047 = vst [vmem:[%s4891_s15 + $0x20] sm:$0xff] %v3032_v55   ;;  %v2584_v60 = vadd.f32 %v3007_v53, %v2545_v58  ;;  %v2546_v61 = vadd.f32 %v4878_v0, %v2526_v21 }
 0x406   : > { %v2585_v26 = vadd.f32 %v3008_v25, %v2546_v61  ;;  %v2597_v3 = vmax.f32 %v2584_v60, 0.0 }
 0x407   : > { %v2502_v2 = vpop.f32.mrb[80].mxu0 }
 0x408   : > { %v2598_v47 = vmax.f32 %v2585_v26, 0.0  ;;  %v2527_v4 = vmul.f32 %v4872_v44, %v2502_v2  ;;  %v3696_v5 = vpop.f32.mrb[81].mxu0 }
 0x409   : > { %v2505_v32 = vpop.f32.mrb[82].mxu0 }
 0x40a   : > { %v3037_v7 = vpack.c.bf16 %v2598_v47, %v2597_v3  ;;  %v2547_v1 = vadd.f32 %v4878_v0, %v2527_v4  ;;  %v3697_v29 = vpop.f32.mrb[83].mxu0 }
 0x40c   : > { %3048 = vst [vmem:[%s4891_s15 + $0x28] sm:$0xff] %v3037_v7   ;;  %v2586_v56 = vadd.f32 %v2573_v28, %v2547_v1 }
 0x40e   : > { %v2599_v36 = vmax.f32 %v2586_v56, 0.0 }
 0x410   : > { %v2984_v30 = vpack.c.bf16 %v2599_v36, %v2599_v36 }
 0x412   : > { %2665 = vst [vmem:[%s4891_s15 + $0x30] sm:$0x3] %v2984_v30 }
 0x413 PF: > { %s20_s13 = sadd.s32 1, %s4036_s13  }
 0x414   : > { %p17_p4 = scmp.ge.s32.totalorder %s20_s13, 4  }
 0x416   :  { %19 = sbr.rel (!%p17_p4) target bundleno = 1 (0x1), region = 98 }

</bundles_post_ra>
